<compile_context>
chip_gen: v7x
topology: tpu7x:2x2x1
jax: 0.10.0
libtpu: 0.0.40
codegen_flags: <defaults>
</compile_context>

<pallas_src>
import functools

import jax
import jax.numpy as jnp
from jax import lax
from jax.experimental import pallas as pl
from jax.experimental.pallas import tpu as pltpu

EPS = 1e-5


# ---------------------------------------------------------------------------
# Generation-aware VMEM / tiling helpers
# ---------------------------------------------------------------------------
@functools.lru_cache(maxsize=None)
def _vmem_limit_bytes():
    """~75% of physical VMEM: v5e/v6e (128 MiB) -> 96 MiB, v7x (64 MiB) -> 48."""
    phys = 64 * 1024 * 1024                      # conservative fallback
    try:
        info = pltpu.get_tpu_info()
        v = int(getattr(info, "vmem_capacity_bytes", 0))
        if v >= (16 << 20):
            phys = v
    except Exception:
        pass
    return max(min((phys * 3) // 4, 100 * 1024 * 1024), 32 * 1024 * 1024)


def _compiler_params():
    return pltpu.CompilerParams(
        dimension_semantics=("parallel",),       # row-blocks shard over TCs
        vmem_limit_bytes=_vmem_limit_bytes(),
    )


def _pick_imgs_per_block(N, H, width_lanes, act_bytes, weight_bytes):
    """Whole images per row-block.

    Budget = (vmem_limit - resident weights) spread over ~4 double-buffered
    activation streams plus ~5 live f32 full-width temporaries per row.
    Prefers >=4 grid steps (2 per v7x TensorCore), then >=2, and respects the
    sublane rule (block rows % 8 (f32) / 16 (bf16) == 0, or the full array).
    """
    per_row = width_lanes * (4 * 2 * act_bytes + 5 * 4)
    budget = max(int(0.8 * (_vmem_limit_bytes() - 2 * weight_bytes)), 1 << 20)
    divs = [b for b in range(1, N + 1) if N % b == 0]
    fit = [b for b in divs if b * H * per_row <= budget] or [1]
    ok = []
    for align in ((16, 8) if act_bytes == 2 else (8,)):
        ok = [b for b in fit if (b * H) % align == 0]
        if ok:
            break
    if not ok:
        # Whole array as one block (block rows == full extent is always legal).
        return N
    for min_steps in (4, 2, 1):
        cand = [b for b in ok if N // b >= min_steps]
        if cand:
            return max(cand)
    return max(ok)


# ---------------------------------------------------------------------------
# Pallas kernels
# ---------------------------------------------------------------------------
def _conv_stage_kernel(*refs, H, mode, fuse_taps):
    """3x3 'same' conv over one block of whole images, layout (rows=B*H, W*C).

    mode:
      "plain"        a = x                                    (first conv1)
      "bn_relu"      a = relu(x*scale + shift)                (conv2; BN1 fused)
      "bn_skip_relu" a = relu(x*scale + shift + skip)         (next layer conv1;
                     previous layer's BN2+skip+ReLU fused, `a` is also stored)

    Emits the raw conv(+bias) output (cast to the activation dtype) plus
    per-block per-lane sum and sum-of-squared-deviations (from the block's own
    per-lane mean) for a numerically stable global BatchNorm reduction.
    """
    it = iter(refs)
    x_ref = next(it)
    if mode != "plain":
        scale_ref, shift_ref = next(it), next(it)
    if mode == "bn_skip_relu":
        skip_ref = next(it)
    w_ref, b_ref = next(it), next(it)
    y_ref, s_ref, q_ref = next(it), next(it), next(it)
    if mode == "bn_skip_relu":
        a_out_ref = next(it)

    if mode == "plain":
        a = x_ref[...].astype(w_ref.dtype)
    else:
        a32 = x_ref[...].astype(jnp.float32) * scale_ref[...] + shift_ref[...]
        if mode == "bn_skip_relu":
            a32 = a32 + skip_ref[...].astype(jnp.float32)
        a = jnp.maximum(a32, 0.0).astype(w_ref.dtype)
    if mode == "bn_skip_relu":
        a_out_ref[...] = a.astype(a_out_ref.dtype)   # previous layer's output

    rows, K = a.shape
    # Vertical halo inside the block: blocks hold whole images, so the halo is
    # a sublane roll (XLU) + zero mask at each image's top/bottom row.
    h_idx = lax.broadcasted_iota(jnp.int32, (rows, 1), 0) % H
    up = jnp.where(h_idx == 0, 0.0, pltpu.roll(a, shift=1, axis=0))
    dn = jnp.where(h_idx == H - 1, 0.0, pltpu.roll(a, shift=rows - 1, axis=0))

    if fuse_taps:
        # One MXU matmul over the lane-concatenated taps (K multiple of 128).
        acc = jnp.dot(jnp.concatenate([up, a, dn], axis=1), w_ref[...],
                      preferred_element_type=jnp.float32)
    else:
        acc = jnp.dot(up, w_ref[pl.ds(0, K), :], preferred_element_type=jnp.float32)
        acc = acc + jnp.dot(a, w_ref[pl.ds(K, K), :], preferred_element_type=jnp.float32)
        acc = acc + jnp.dot(dn, w_ref[pl.ds(2 * K, K), :], preferred_element_type=jnp.float32)
    acc = acc + b_ref[...]

    y_ref[...] = acc.astype(y_ref.dtype)
    s = jnp.sum(acc, axis=0, keepdims=True)
    d = acc - s * (1.0 / rows)
    q = jnp.sum(d * d, axis=0, keepdims=True)
    s_ref[...] = s[None]
    q_ref[...] = q[None]


def _bn_skip_relu_kernel(y_ref, scale_ref, shift_ref, skip_ref, out_ref):
    """Final layer epilogue: BN2 affine + skip add + ReLU."""
    out_ref[...] = jnp.maximum(
        y_ref[...].astype(jnp.float32) * scale_ref[...] + shift_ref[...]
        + skip_ref[...].astype(jnp.float32), 0.0).astype(out_ref.dtype)


# ---------------------------------------------------------------------------
# pallas_call wrappers
# ---------------------------------------------------------------------------
def _full_spec(shape):
    # Grid-invariant operand (weights / scale / shift / bias).  These are tiny
    # here; for large W*C mark them single-buffered (pl.Buffered(1)).
    return pl.BlockSpec(shape, lambda *_: (0,) * len(shape))


def _conv_stage(x2d, w_stack, bias_row, *, H, B, act_dtype,
                scale=None, shift=None, skip2d=None):
    M, K = x2d.shape
    WCo = w_stack.shape[1]
    rows = B * H
    grid = (M // rows,)
    mode = ("plain" if scale is None
            else "bn_relu" if skip2d is None else "bn_skip_relu")
    fuse_taps = (K % 128 == 0)

    args = [x2d]
    in_specs = [pl.BlockSpec((rows, K), lambda i: (i, 0))]
    if mode != "plain":
        args += [scale, shift]
        in_specs += [_full_spec((1, K)), _full_spec((1, K))]
    if mode == "bn_skip_relu":
        args.append(skip2d)
        in_specs.append(pl.BlockSpec((rows, K), lambda i: (i, 0)))
    args += [w_stack, bias_row]
    in_specs += [_full_spec(w_stack.shape), _full_spec((1, WCo))]

    out_specs = [pl.BlockSpec((rows, WCo), lambda i: (i, 0)),
                 pl.BlockSpec((1, 1, WCo), lambda i: (i, 0, 0)),
                 pl.BlockSpec((1, 1, WCo), lambda i: (i, 0, 0))]
    out_shape = [jax.ShapeDtypeStruct((M, WCo), act_dtype),
                 jax.ShapeDtypeStruct((grid[0], 1, WCo), jnp.float32),
                 jax.ShapeDtypeStruct((grid[0], 1, WCo), jnp.float32)]
    if mode == "bn_skip_relu":
        out_specs.append(pl.BlockSpec((rows, K), lambda i: (i, 0)))
        out_shape.append(jax.ShapeDtypeStruct((M, K), act_dtype))

    act_bytes = jnp.dtype(act_dtype).itemsize
    bytes_acc = (M * (K + WCo) * act_bytes
                 + (2 * M * K * act_bytes if mode == "bn_skip_relu" else 0)
                 + int(w_stack.size) * w_stack.dtype.itemsize)
    cost = pl.CostEstimate(flops=int(2 * M * 3 * K * WCo), transcendentals=0,
                           bytes_accessed=int(bytes_acc))

    kernel = functools.partial(_conv_stage_kernel, H=H, mode=mode,
                               fuse_taps=fuse_taps)
    return pl.pallas_call(
        kernel,
        grid=grid,
        in_specs=in_specs,
        out_specs=tuple(out_specs),
        out_shape=tuple(out_shape),
        compiler_params=_compiler_params(),
        cost_estimate=cost,
    )(*args)


def _bn_skip_relu(y2d, scale, shift, skip2d, *, H, B):
    M, WC = y2d.shape
    rows = B * H
    grid = (M // rows,)
    cost = pl.CostEstimate(
        flops=int(3 * M * WC), transcendentals=0,
        bytes_accessed=int(M * WC * (y2d.dtype.itemsize
                                     + skip2d.dtype.itemsize + 4)))
    return pl.pallas_call(
        _bn_skip_relu_kernel,
        grid=grid,
        in_specs=[pl.BlockSpec((rows, WC), lambda i: (i, 0)),
                  _full_spec((1, WC)), _full_spec((1, WC)),
                  pl.BlockSpec((rows, WC), lambda i: (i, 0))],
        out_specs=pl.BlockSpec((rows, WC), lambda i: (i, 0)),
        out_shape=jax.ShapeDtypeStruct((M, WC), jnp.float32),
        compiler_params=_compiler_params(),
        cost_estimate=cost,
    )(y2d, scale, shift, skip2d)


# ---------------------------------------------------------------------------
# Weight preparation + BN finalize (tiny host-side JAX)
# ---------------------------------------------------------------------------
def _stacked_row_conv_mat(w_hwio, W, dtype):
    """(3,3,Cin,Cout) conv weights -> stacked (3*W*Cin, W*Cout) banded matrices
    (one per vertical tap) applying the horizontal 3-tap 'same' conv to a whole
    flattened image row at once."""
    _, _, Cin, Cout = w_hwio.shape
    w_in = jnp.arange(W)[:, None]
    w_out = jnp.arange(W)[None, :]
    kx = w_in - w_out + 1
    valid = (kx >= 0) & (kx <= 2)
    kxc = jnp.clip(kx, 0, 2)
    mats = []
    for ky in range(3):
        m = w_hwio[ky][kxc]                           # (W, W, Cin, Cout)
        m = jnp.where(valid[:, :, None, None], m, 0.0)
        mats.append(m.transpose(0, 2, 1, 3).reshape(W * Cin, W * Cout))
    return jnp.concatenate(mats, axis=0).astype(dtype)


def _finalize_bn(s, q, gamma, beta, *, W, rows_per_block, count):
    """Merge per-block (sum, sum-of-squared-deviations-from-block-mean) into
    global batch statistics (Chan parallel-variance formula) and fold
    mean/var/gamma/beta into a per-lane scale/shift of width W*C."""
    C = gamma.shape[0]
    s = s.reshape(-1, W, C)
    q = q.reshape(-1, W, C)
    mean = s.sum(axis=(0, 1)) / count
    mu_blk = s / rows_per_block
    var = (q.sum(axis=(0, 1))
           + (rows_per_block * (mu_blk - mean) ** 2).sum(axis=(0, 1))) / count
    var = jnp.maximum(var, 0.0)
    scale = gamma * lax.rsqrt(var + EPS)
    shift = beta - mean * scale
    return jnp.tile(scale, W)[None, :], jnp.tile(shift, W)[None, :]


# ---------------------------------------------------------------------------
# Module forward
# ---------------------------------------------------------------------------
def residual_block(x_nchw, layer_params, *, compute_dtype=jnp.bfloat16):
    """ResidualBlock forward (BatchNorm uses batch statistics, i.e. the
    training-mode forward of nn.BatchNorm2d).  `compute_dtype` is the MXU
    operand / stored-activation dtype; BN statistics are always f32."""
    N, Cin0, H, W = x_nchw.shape
    x2d = jnp.transpose(x_nchw, (0, 2, 3, 1)).reshape(N * H, W * Cin0)

    cmax = max([Cin0] + [p["g1"].shape[0] for p in layer_params])
    act_bytes = jnp.dtype(compute_dtype).itemsize
    weight_bytes = 3 * (W * cmax) * (W * cmax) * act_bytes
    B = _pick_imgs_per_block(N, H, W * cmax, act_bytes, weight_bytes)
    rows_per_block = B * H
    count = N * H * W

    def finalize(s, q, g, be):
        return _finalize_bn(s, q, g, be, W=W,
                            rows_per_block=rows_per_block, count=count)

    def bias_row(b):
        return jnp.tile(b, W)[None, :].astype(jnp.float32)

    # ---- layer 0 ---------------------------------------------------------
    p0 = layer_params[0]
    cout = p0["g1"].shape[0]
    if Cin0 != cout:
        # 1x1 skip projection as a plain dense matmul (per review: avoid the
        # 1/W-dense block-diagonal (W*Cin, W*Cout) weight).
        skip = x2d.reshape(N * H * W, Cin0) @ p0["wskip"] + p0["bskip"]
        skip = skip.reshape(N * H, W * cout)
    else:
        skip = x2d
    skip = skip.astype(compute_dtype)

    y1, s1, q1 = _conv_stage(
        x2d.astype(compute_dtype),
        _stacked_row_conv_mat(p0["w1"], W, compute_dtype), bias_row(p0["b1"]),
        H=H, B=B, act_dtype=compute_dtype)
    sc, sh = finalize(s1, q1, p0["g1"], p0["be1"])
    y2, s2, q2 = _conv_stage(
        y1, _stacked_row_conv_mat(p0["w2"], W, compute_dtype), bias_row(p0["b2"]),
        H=H, B=B, act_dtype=compute_dtype, scale=sc, shift=sh)
    sc, sh = finalize(s2, q2, p0["g2"], p0["be2"])

    # ---- layers 1..L-1 (previous BN2+skip+ReLU fused into this conv1) -----
    for p in layer_params[1:]:
        y1, s1, q1, skip = _conv_stage(
            y2, _stacked_row_conv_mat(p["w1"], W, compute_dtype), bias_row(p["b1"]),
            H=H, B=B, act_dtype=compute_dtype, scale=sc, shift=sh, skip2d=skip)
        sc1, sh1 = finalize(s1, q1, p["g1"], p["be1"])
        y2, s2, q2 = _conv_stage(
            y1, _stacked_row_conv_mat(p["w2"], W, compute_dtype), bias_row(p["b2"]),
            H=H, B=B, act_dtype=compute_dtype, scale=sc1, shift=sh1)
        sc, sh = finalize(s2, q2, p["g2"], p["be2"])

    # ---- final epilogue: last layer's BN2 + skip + ReLU -------------------
    out2d = _bn_skip_relu(y2, sc, sh, skip, H=H, B=B)
    cfin = layer_params[-1]["g1"].shape[0]
    return jnp.transpose(out2d.reshape(N, H, W, cfin), (0, 3, 1, 2))


# ---------------------------------------------------------------------------
# Deterministic parameter construction (shapes as in ResidualBlock.__init__)
# ---------------------------------------------------------------------------
def init_params(key, in_channels, out_channels, num_of_residual_convs):
    layers = []
    for i in range(num_of_residual_convs):
        cin = in_channels if i == 0 else out_channels
        key, *ks = jax.random.split(key, 7)
        p = {
            "w1": 0.1 * jax.random.normal(ks[0], (3, 3, cin, out_channels), jnp.float32),
            "b1": 0.1 * jax.random.normal(ks[1], (out_channels,), jnp.float32),
            "g1": jnp.ones((out_channels,), jnp.float32),
            "be1": jnp.zeros((out_channels,), jnp.float32),
            "w2": 0.1 * jax.random.normal(ks[2], (3, 3, out_channels, out_channels), jnp.float32),
            "b2": 0.1 * jax.random.normal(ks[3], (out_channels,), jnp.float32),
            "g2": jnp.ones((out_channels,), jnp.float32),
            "be2": jnp.zeros((out_channels,), jnp.float32),
        }
        if cin != out_channels:
            p["wskip"] = 0.1 * jax.random.normal(ks[4], (cin, out_channels), jnp.float32)
            p["bskip"] = 0.1 * jax.random.normal(ks[5], (out_channels,), jnp.float32)
        layers.append(p)
    return layers


# ---------------------------------------------------------------------------
# Pure-JAX f32 reference (exact module math) for validation
# ---------------------------------------------------------------------------
def ref_residual_block(x_nchw, layer_params):
    x = jnp.transpose(x_nchw, (0, 2, 3, 1))

    def conv(h, w, b):
        return lax.conv_general_dilated(
            h, w, (1, 1), "SAME",
            dimension_numbers=("NHWC", "HWIO", "NHWC"),
            precision=lax.Precision.HIGHEST) + b

    def bn(h, g, be):
        mean = jnp.mean(h, axis=(0, 1, 2), keepdims=True)
        var = jnp.mean((h - mean) ** 2, axis=(0, 1, 2), keepdims=True)
        return (h - mean) * lax.rsqrt(var + EPS) * g + be

    for p in layer_params:
        cin, cout = x.shape[-1], p["w1"].shape[-1]
        skip = (jnp.einsum("nhwc,cd->nhwd", x, p["wskip"],
                           precision=lax.Precision.HIGHEST) + p["bskip"]
                if cin != cout else x)
        h = jnp.maximum(bn(conv(x, p["w1"], p["b1"]), p["g1"], p["be1"]), 0.0)
        h = bn(conv(h, p["w2"], p["b2"]), p["g2"], p["be2"]) + skip
        x = jnp.maximum(h, 0.0)
    return jnp.transpose(x, (0, 3, 1, 2))


if __name__ == "__main__":
    key = jax.random.PRNGKey(0)
    kx, kp = jax.random.split(key)

    # ResidualBlock(in_channels=4, out_channels=8, num_of_residual_convs=2)
    x = jax.random.normal(kx, (2, 4, 16, 16), jnp.float32)   # NCHW, like PyTorch
    params = init_params(kp, in_channels=4, out_channels=8,
                         num_of_residual_convs=2)

    ref = ref_residual_block(x, params)

    # f32-operand validation path: tight enough to catch halo / indexing bugs.
    out_f32 = jax.block_until_ready(
        jax.jit(functools.partial(residual_block, compute_dtype=jnp.float32))(x, params))
    assert out_f32.shape == (2, 8, 16, 16), out_f32.shape
    err32 = float(jnp.max(jnp.abs(out_f32 - ref)))
    assert jnp.allclose(out_f32, ref, atol=5e-2, rtol=5e-2), f"f32 max abs err {err32}"

    # bf16 fast path (bf16 MXU operands and stored activations, f32 BN stats).
    out_bf16 = jax.block_until_ready(jax.jit(residual_block)(x, params))
    assert out_bf16.shape == (2, 8, 16, 16), out_bf16.shape
    err16 = float(jnp.max(jnp.abs(out_bf16 - ref)))
    assert jnp.allclose(out_bf16, ref, atol=1.5e-1, rtol=1.5e-1), f"bf16 max abs err {err16}"

    print("KERNEL_OK")
</pallas_src>

<mosaic_0001>
module attributes {stable_mosaic.version = 11 : i64} {
  func.func @_conv_stage_kernel(%arg0: i32, %arg1: memref<16x64xf32, #tpu.memory_space<vmem>>, %arg2: memref<192x128xf32, #tpu.memory_space<vmem>>, %arg3: memref<1x128xf32, #tpu.memory_space<vmem>>, %arg4: memref<16x128xf32, #tpu.memory_space<vmem>>, %arg5: memref<1x1x128xf32, #tpu.memory_space<vmem>>, %arg6: memref<1x1x128xf32, #tpu.memory_space<vmem>>) attributes {dimension_semantics = [#tpu.dimension_semantics<parallel>], iteration_bounds = array<i64: 2>, scalar_prefetch = 0 : i64, scratch_operands = 0 : i64, tpu.core_type = #tpu.core_type<tc>, window_params = [{transform_indices = @transform_0, window_bounds = array<i64: 16, 64>}, {pipeline_mode = #tpu.pipeline_mode<synchronous>, transform_indices = @transform_1, window_bounds = array<i64: 192, 128>}, {pipeline_mode = #tpu.pipeline_mode<synchronous>, transform_indices = @transform_2, window_bounds = array<i64: 1, 128>}, {transform_indices = @transform_3, window_bounds = array<i64: 16, 128>}, {transform_indices = @transform_4, window_bounds = array<i64: 1, 1, 128>}, {transform_indices = @transform_5, window_bounds = array<i64: 1, 1, 128>}]} {
    %c0 = arith.constant 0 : index
    %c0_0 = arith.constant 0 : index
    %0 = vector.load %arg1[%c0, %c0_0] : memref<16x64xf32, #tpu.memory_space<vmem>>, vector<16x64xf32>
    %1 = tpu.iota {dimensions = array<i32: 0>} : vector<16x1xi32>
    %c16_i32 = arith.constant 16 : i32
    %c0_i32 = arith.constant 0 : i32
    %2 = arith.cmpi eq, %c16_i32, %c0_i32 : i32
    %c1_i32 = arith.constant 1 : i32
    %3 = arith.select %2, %c1_i32, %c16_i32 : i32
    %4 = vector.broadcast %3 : i32 to vector<16x1xi32>
    %5 = arith.remsi %1, %4 : vector<16x1xi32>
    %c0_i32_1 = arith.constant 0 : i32
    %6 = vector.broadcast %c0_i32_1 : i32 to vector<16x1xi32>
    %7 = arith.cmpi ne, %5, %6 : vector<16x1xi32>
    %c0_i32_2 = arith.constant 0 : i32
    %8 = vector.broadcast %c0_i32_2 : i32 to vector<16x1xi32>
    %9 = arith.cmpi slt, %5, %8 : vector<16x1xi32>
    %c0_i32_3 = arith.constant 0 : i32
    %10 = arith.cmpi slt, %3, %c0_i32_3 : i32
    %11 = vector.broadcast %10 : i1 to vector<16x1xi1>
    %12 = vector.broadcast %11 : vector<16x1xi1> to vector<16x1xi1>
    %13 = arith.xori %9, %12 : vector<16x1xi1>
    %14 = arith.andi %13, %7 : vector<16x1xi1>
    %15 = vector.broadcast %3 : i32 to vector<16x1xi32>
    %16 = arith.addi %5, %15 : vector<16x1xi32>
    %17 = arith.select %14, %16, %5 : vector<16x1xi1>, vector<16x1xi32>
    %c0_i32_4 = arith.constant 0 : i32
    %18 = vector.broadcast %c0_i32_4 : i32 to vector<16x1xi32>
    %19 = arith.cmpi eq, %17, %18 : vector<16x1xi32>
    %c1_i32_5 = arith.constant 1 : i32
    %20 = tpu.dynamic_rotate %0 by %c1_i32_5 dim 0 : vector<16x64xf32>, i32 -> vector<16x64xf32>
    %cst = arith.constant 0.000000e+00 : f32
    %21 = vector.shape_cast %19 : vector<16x1xi1> to vector<16x1xi1>
    %22 = vector.broadcast %21 : vector<16x1xi1> to vector<16x64xi1>
    %23 = vector.broadcast %cst : f32 to vector<16x64xf32>
    %24 = arith.select %22, %23, %20 : vector<16x64xi1>, vector<16x64xf32>
    %c15_i32 = arith.constant 15 : i32
    %25 = vector.broadcast %c15_i32 : i32 to vector<16x1xi32>
    %26 = arith.cmpi eq, %17, %25 : vector<16x1xi32>
    %c15_i32_6 = arith.constant 15 : i32
    %27 = tpu.dynamic_rotate %0 by %c15_i32_6 dim 0 : vector<16x64xf32>, i32 -> vector<16x64xf32>
    %cst_7 = arith.constant 0.000000e+00 : f32
    %28 = vector.shape_cast %26 : vector<16x1xi1> to vector<16x1xi1>
    %29 = vector.broadcast %28 : vector<16x1xi1> to vector<16x64xi1>
    %30 = vector.broadcast %cst_7 : f32 to vector<16x64xf32>
    %31 = arith.select %29, %30, %27 : vector<16x64xi1>, vector<16x64xf32>
    %c0_8 = arith.constant 0 : index
    %c0_9 = arith.constant 0 : index
    %32 = vector.load %arg2[%c0_8, %c0_9] : memref<192x128xf32, #tpu.memory_space<vmem>>, vector<64x128xf32>
    %cst_10 = arith.constant dense<0.000000e+00> : vector<16x128xf32>
    %33 = tpu.matmul %24, %32, %cst_10 {dimension_numbers = #tpu.dot_dimension_numbers<[1], [0], [0], [1], [0, 0, 1, 1], [], []>} : vector<16x64xf32>, vector<64x128xf32>, vector<16x128xf32> -> vector<16x128xf32>
    %c64 = arith.constant 64 : index
    %c0_11 = arith.constant 0 : index
    %34 = vector.load %arg2[%c64, %c0_11] : memref<192x128xf32, #tpu.memory_space<vmem>>, vector<64x128xf32>
    %cst_12 = arith.constant dense<0.000000e+00> : vector<16x128xf32>
    %35 = tpu.matmul %0, %34, %cst_12 {dimension_numbers = #tpu.dot_dimension_numbers<[1], [0], [0], [1], [0, 0, 1, 1], [], []>} : vector<16x64xf32>, vector<64x128xf32>, vector<16x128xf32> -> vector<16x128xf32>
    %36 = arith.addf %33, %35 : vector<16x128xf32>
    %c128 = arith.constant 128 : index
    %c0_13 = arith.constant 0 : index
    %37 = vector.load %arg2[%c128, %c0_13] : memref<192x128xf32, #tpu.memory_space<vmem>>, vector<64x128xf32>
    %cst_14 = arith.constant dense<0.000000e+00> : vector<16x128xf32>
    %38 = tpu.matmul %31, %37, %cst_14 {dimension_numbers = #tpu.dot_dimension_numbers<[1], [0], [0], [1], [0, 0, 1, 1], [], []>} : vector<16x64xf32>, vector<64x128xf32>, vector<16x128xf32> -> vector<16x128xf32>
    %39 = arith.addf %36, %38 : vector<16x128xf32>
    %c0_15 = arith.constant 0 : index
    %c0_16 = arith.constant 0 : index
    %40 = vector.load %arg3[%c0_15, %c0_16] : memref<1x128xf32, #tpu.memory_space<vmem>>, vector<1x128xf32>
    %41 = vector.broadcast %40 : vector<1x128xf32> to vector<16x128xf32>
    %42 = arith.addf %39, %41 : vector<16x128xf32>
    %c0_17 = arith.constant 0 : index
    %c0_18 = arith.constant 0 : index
    %43 = vector.load %arg4[%c0_17, %c0_18] : memref<16x128xf32, #tpu.memory_space<vmem>>, vector<16x128xf32>
    tpu.vector_store %arg4[%c0_17, %c0_18], %42 {strides = array<i32>} : memref<16x128xf32, #tpu.memory_space<vmem>>, vector<16x128xf32>,
    %cst_19 = arith.constant dense<0.000000e+00> : vector<128xf32>
    %44 = vector.multi_reduction <add>, %42, %cst_19 [0] : vector<16x128xf32> to vector<128xf32>
    %45 = vector.shape_cast %44 : vector<128xf32> to vector<1x128xf32>
    %cst_20 = arith.constant 6.250000e-02 : f32
    %46 = vector.broadcast %cst_20 : f32 to vector<1x128xf32>
    %47 = arith.mulf %45, %46 : vector<1x128xf32>
    %48 = vector.broadcast %47 : vector<1x128xf32> to vector<16x128xf32>
    %49 = arith.subf %42, %48 : vector<16x128xf32>
    %50 = arith.mulf %49, %49 : vector<16x128xf32>
    %cst_21 = arith.constant dense<0.000000e+00> : vector<128xf32>
    %51 = vector.multi_reduction <add>, %50, %cst_21 [0] : vector<16x128xf32> to vector<128xf32>
    %52 = vector.shape_cast %51 : vector<128xf32> to vector<1x128xf32>
    %53 = vector.shape_cast %45 : vector<1x128xf32> to vector<1x1x128xf32>
    %c0_22 = arith.constant 0 : index
    %c0_23 = arith.constant 0 : index
    %c0_24 = arith.constant 0 : index
    %54 = vector.load %arg5[%c0_22, %c0_23, %c0_24] : memref<1x1x128xf32, #tpu.memory_space<vmem>>, vector<1x1x128xf32>
    tpu.vector_store %arg5[%c0_22, %c0_23, %c0_24], %53 {strides = array<i32>} : memref<1x1x128xf32, #tpu.memory_space<vmem>>, vector<1x1x128xf32>,
    %55 = vector.shape_cast %52 : vector<1x128xf32> to vector<1x1x128xf32>
    %c0_25 = arith.constant 0 : index
    %c0_26 = arith.constant 0 : index
    %c0_27 = arith.constant 0 : index
    %56 = vector.load %arg6[%c0_25, %c0_26, %c0_27] : memref<1x1x128xf32, #tpu.memory_space<vmem>>, vector<1x1x128xf32>
    tpu.vector_store %arg6[%c0_25, %c0_26, %c0_27], %55 {strides = array<i32>} : memref<1x1x128xf32, #tpu.memory_space<vmem>>, vector<1x1x128xf32>,
    return
  }
  func.func @transform_0(%arg0: i32) -> (i32, i32) {
    %c0_i32 = arith.constant 0 : i32
    %c0_i32_0 = arith.constant 0 : i32
    return %arg0, %c0_i32 : i32, i32
  }
  func.func @transform_1(%arg0: i32) -> (i32, i32) {
    %c0_i32 = arith.constant 0 : i32
    %c0_i32_0 = arith.constant 0 : i32
    %c0_i32_1 = arith.constant 0 : i32
    return %c0_i32, %c0_i32_0 : i32, i32
  }
  func.func @transform_2(%arg0: i32) -> (i32, i32) {
    %c0_i32 = arith.constant 0 : i32
    %c0_i32_0 = arith.constant 0 : i32
    %c0_i32_1 = arith.constant 0 : i32
    return %c0_i32, %c0_i32_0 : i32, i32
  }
  func.func @transform_3(%arg0: i32) -> (i32, i32) {
    %c0_i32 = arith.constant 0 : i32
    %c0_i32_0 = arith.constant 0 : i32
    return %arg0, %c0_i32 : i32, i32
  }
  func.func @transform_4(%arg0: i32) -> (i32, i32, i32) {
    %c0_i32 = arith.constant 0 : i32
    %c0_i32_0 = arith.constant 0 : i32
    %c0_i32_1 = arith.constant 0 : i32
    return %arg0, %c0_i32, %c0_i32_0 : i32, i32, i32
  }
  func.func @transform_5(%arg0: i32) -> (i32, i32, i32) {
    %c0_i32 = arith.constant 0 : i32
    %c0_i32_0 = arith.constant 0 : i32
    %c0_i32_1 = arith.constant 0 : i32
    return %arg0, %c0_i32, %c0_i32_0 : i32, i32, i32
  }
}

module attributes {stable_mosaic.version = 11 : i64} {
  func.func @_conv_stage_kernel(%arg0: i32, %arg1: memref<16x128xf32, #tpu.memory_space<vmem>>, %arg2: memref<1x128xf32, #tpu.memory_space<vmem>>, %arg3: memref<1x128xf32, #tpu.memory_space<vmem>>, %arg4: memref<384x128xf32, #tpu.memory_space<vmem>>, %arg5: memref<1x128xf32, #tpu.memory_space<vmem>>, %arg6: memref<16x128xf32, #tpu.memory_space<vmem>>, %arg7: memref<1x1x128xf32, #tpu.memory_space<vmem>>, %arg8: memref<1x1x128xf32, #tpu.memory_space<vmem>>) attributes {dimension_semantics = [#tpu.dimension_semantics<parallel>], iteration_bounds = array<i64: 2>, scalar_prefetch = 0 : i64, scratch_operands = 0 : i64, tpu.core_type = #tpu.core_type<tc>, window_params = [{transform_indices = @transform_0, window_bounds = array<i64: 16, 128>}, {pipeline_mode = #tpu.pipeline_mode<synchronous>, transform_indices = @transform_1, window_bounds = array<i64: 1, 128>}, {pipeline_mode = #tpu.pipeline_mode<synchronous>, transform_indices = @transform_2, window_bounds = array<i64: 1, 128>}, {pipeline_mode = #tpu.pipeline_mode<synchronous>, transform_indices = @transform_3, window_bounds = array<i64: 384, 128>}, {pipeline_mode = #tpu.pipeline_mode<synchronous>, transform_indices = @transform_4, window_bounds = array<i64: 1, 128>}, {transform_indices = @transform_5, window_bounds = array<i64: 16, 128>}, {transform_indices = @transform_6, window_bounds = array<i64: 1, 1, 128>}, {transform_indices = @transform_7, window_bounds = array<i64: 1, 1, 128>}]} {
    %c0 = arith.constant 0 : index
    %c0_0 = arith.constant 0 : index
    %0 = vector.load %arg1[%c0, %c0_0] : memref<16x128xf32, #tpu.memory_space<vmem>>, vector<16x128xf32>
    %c0_1 = arith.constant 0 : index
    %c0_2 = arith.constant 0 : index
    %1 = vector.load %arg2[%c0_1, %c0_2] : memref<1x128xf32, #tpu.memory_space<vmem>>, vector<1x128xf32>
    %2 = vector.broadcast %1 : vector<1x128xf32> to vector<16x128xf32>
    %3 = arith.mulf %0, %2 : vector<16x128xf32>
    %c0_3 = arith.constant 0 : index
    %c0_4 = arith.constant 0 : index
    %4 = vector.load %arg3[%c0_3, %c0_4] : memref<1x128xf32, #tpu.memory_space<vmem>>, vector<1x128xf32>
    %5 = vector.broadcast %4 : vector<1x128xf32> to vector<16x128xf32>
    %6 = arith.addf %3, %5 : vector<16x128xf32>
    %cst = arith.constant 0.000000e+00 : f32
    %7 = vector.broadcast %cst : f32 to vector<16x128xf32>
    %8 = arith.maximumf %6, %7 : vector<16x128xf32>
    %9 = tpu.iota {dimensions = array<i32: 0>} : vector<16x1xi32>
    %c16_i32 = arith.constant 16 : i32
    %c0_i32 = arith.constant 0 : i32
    %10 = arith.cmpi eq, %c16_i32, %c0_i32 : i32
    %c1_i32 = arith.constant 1 : i32
    %11 = arith.select %10, %c1_i32, %c16_i32 : i32
    %12 = vector.broadcast %11 : i32 to vector<16x1xi32>
    %13 = arith.remsi %9, %12 : vector<16x1xi32>
    %c0_i32_5 = arith.constant 0 : i32
    %14 = vector.broadcast %c0_i32_5 : i32 to vector<16x1xi32>
    %15 = arith.cmpi ne, %13, %14 : vector<16x1xi32>
    %c0_i32_6 = arith.constant 0 : i32
    %16 = vector.broadcast %c0_i32_6 : i32 to vector<16x1xi32>
    %17 = arith.cmpi slt, %13, %16 : vector<16x1xi32>
    %c0_i32_7 = arith.constant 0 : i32
    %18 = arith.cmpi slt, %11, %c0_i32_7 : i32
    %19 = vector.broadcast %18 : i1 to vector<16x1xi1>
    %20 = vector.broadcast %19 : vector<16x1xi1> to vector<16x1xi1>
    %21 = arith.xori %17, %20 : vector<16x1xi1>
    %22 = arith.andi %21, %15 : vector<16x1xi1>
    %23 = vector.broadcast %11 : i32 to vector<16x1xi32>
    %24 = arith.addi %13, %23 : vector<16x1xi32>
    %25 = arith.select %22, %24, %13 : vector<16x1xi1>, vector<16x1xi32>
    %c0_i32_8 = arith.constant 0 : i32
    %26 = vector.broadcast %c0_i32_8 : i32 to vector<16x1xi32>
    %27 = arith.cmpi eq, %25, %26 : vector<16x1xi32>
    %c1_i32_9 = arith.constant 1 : i32
    %28 = tpu.dynamic_rotate %8 by %c1_i32_9 dim 0 : vector<16x128xf32>, i32 -> vector<16x128xf32>
    %cst_10 = arith.constant 0.000000e+00 : f32
    %29 = vector.shape_cast %27 : vector<16x1xi1> to vector<16x1xi1>
    %30 = vector.broadcast %29 : vector<16x1xi1> to vector<16x128xi1>
    %31 = vector.broadcast %cst_10 : f32 to vector<16x128xf32>
    %32 = arith.select %30, %31, %28 : vector<16x128xi1>, vector<16x128xf32>
    %c15_i32 = arith.constant 15 : i32
    %33 = vector.broadcast %c15_i32 : i32 to vector<16x1xi32>
    %34 = arith.cmpi eq, %25, %33 : vector<16x1xi32>
    %c15_i32_11 = arith.constant 15 : i32
    %35 = tpu.dynamic_rotate %8 by %c15_i32_11 dim 0 : vector<16x128xf32>, i32 -> vector<16x128xf32>
    %cst_12 = arith.constant 0.000000e+00 : f32
    %36 = vector.shape_cast %34 : vector<16x1xi1> to vector<16x1xi1>
    %37 = vector.broadcast %36 : vector<16x1xi1> to vector<16x128xi1>
    %38 = vector.broadcast %cst_12 : f32 to vector<16x128xf32>
    %39 = arith.select %37, %38, %35 : vector<16x128xi1>, vector<16x128xf32>
    %40 = tpu.concatenate %32, %8, %39 in 1 : vector<16x128xf32>, vector<16x128xf32>, vector<16x128xf32> -> vector<16x384xf32>
    %c0_13 = arith.constant 0 : index
    %c0_14 = arith.constant 0 : index
    %41 = vector.load %arg4[%c0_13, %c0_14] : memref<384x128xf32, #tpu.memory_space<vmem>>, vector<384x128xf32>
    %cst_15 = arith.constant dense<0.000000e+00> : vector<16x128xf32>
    %42 = tpu.matmul %40, %41, %cst_15 {dimension_numbers = #tpu.dot_dimension_numbers<[1], [0], [0], [1], [0, 0, 1, 1], [], []>} : vector<16x384xf32>, vector<384x128xf32>, vector<16x128xf32> -> vector<16x128xf32>
    %c0_16 = arith.constant 0 : index
    %c0_17 = arith.constant 0 : index
    %43 = vector.load %arg5[%c0_16, %c0_17] : memref<1x128xf32, #tpu.memory_space<vmem>>, vector<1x128xf32>
    %44 = vector.broadcast %43 : vector<1x128xf32> to vector<16x128xf32>
    %45 = arith.addf %42, %44 : vector<16x128xf32>
    %c0_18 = arith.constant 0 : index
    %c0_19 = arith.constant 0 : index
    %46 = vector.load %arg6[%c0_18, %c0_19] : memref<16x128xf32, #tpu.memory_space<vmem>>, vector<16x128xf32>
    tpu.vector_store %arg6[%c0_18, %c0_19], %45 {strides = array<i32>} : memref<16x128xf32, #tpu.memory_space<vmem>>, vector<16x128xf32>,
    %cst_20 = arith.constant dense<0.000000e+00> : vector<128xf32>
    %47 = vector.multi_reduction <add>, %45, %cst_20 [0] : vector<16x128xf32> to vector<128xf32>
    %48 = vector.shape_cast %47 : vector<128xf32> to vector<1x128xf32>
    %cst_21 = arith.constant 6.250000e-02 : f32
    %49 = vector.broadcast %cst_21 : f32 to vector<1x128xf32>
    %50 = arith.mulf %48, %49 : vector<1x128xf32>
    %51 = vector.broadcast %50 : vector<1x128xf32> to vector<16x128xf32>
    %52 = arith.subf %45, %51 : vector<16x128xf32>
    %53 = arith.mulf %52, %52 : vector<16x128xf32>
    %cst_22 = arith.constant dense<0.000000e+00> : vector<128xf32>
    %54 = vector.multi_reduction <add>, %53, %cst_22 [0] : vector<16x128xf32> to vector<128xf32>
    %55 = vector.shape_cast %54 : vector<128xf32> to vector<1x128xf32>
    %56 = vector.shape_cast %48 : vector<1x128xf32> to vector<1x1x128xf32>
    %c0_23 = arith.constant 0 : index
    %c0_24 = arith.constant 0 : index
    %c0_25 = arith.constant 0 : index
    %57 = vector.load %arg7[%c0_23, %c0_24, %c0_25] : memref<1x1x128xf32, #tpu.memory_space<vmem>>, vector<1x1x128xf32>
    tpu.vector_store %arg7[%c0_23, %c0_24, %c0_25], %56 {strides = array<i32>} : memref<1x1x128xf32, #tpu.memory_space<vmem>>, vector<1x1x128xf32>,
    %58 = vector.shape_cast %55 : vector<1x128xf32> to vector<1x1x128xf32>
    %c0_26 = arith.constant 0 : index
    %c0_27 = arith.constant 0 : index
    %c0_28 = arith.constant 0 : index
    %59 = vector.load %arg8[%c0_26, %c0_27, %c0_28] : memref<1x1x128xf32, #tpu.memory_space<vmem>>, vector<1x1x128xf32>
    tpu.vector_store %arg8[%c0_26, %c0_27, %c0_28], %58 {strides = array<i32>} : memref<1x1x128xf32, #tpu.memory_space<vmem>>, vector<1x1x128xf32>,
    return
  }
  func.func @transform_0(%arg0: i32) -> (i32, i32) {
    %c0_i32 = arith.constant 0 : i32
    %c0_i32_0 = arith.constant 0 : i32
    return %arg0, %c0_i32 : i32, i32
  }
  func.func @transform_1(%arg0: i32) -> (i32, i32) {
    %c0_i32 = arith.constant 0 : i32
    %c0_i32_0 = arith.constant 0 : i32
    %c0_i32_1 = arith.constant 0 : i32
    return %c0_i32, %c0_i32_0 : i32, i32
  }
  func.func @transform_2(%arg0: i32) -> (i32, i32) {
    %c0_i32 = arith.constant 0 : i32
    %c0_i32_0 = arith.constant 0 : i32
    %c0_i32_1 = arith.constant 0 : i32
    return %c0_i32, %c0_i32_0 : i32, i32
  }
  func.func @transform_3(%arg0: i32) -> (i32, i32) {
    %c0_i32 = arith.constant 0 : i32
    %c0_i32_0 = arith.constant 0 : i32
    %c0_i32_1 = arith.constant 0 : i32
    return %c0_i32, %c0_i32_0 : i32, i32
  }
  func.func @transform_4(%arg0: i32) -> (i32, i32) {
    %c0_i32 = arith.constant 0 : i32
    %c0_i32_0 = arith.constant 0 : i32
    %c0_i32_1 = arith.constant 0 : i32
    return %c0_i32, %c0_i32_0 : i32, i32
  }
  func.func @transform_5(%arg0: i32) -> (i32, i32) {
    %c0_i32 = arith.constant 0 : i32
    %c0_i32_0 = arith.constant 0 : i32
    return %arg0, %c0_i32 : i32, i32
  }
  func.func @transform_6(%arg0: i32) -> (i32, i32, i32) {
    %c0_i32 = arith.constant 0 : i32
    %c0_i32_0 = arith.constant 0 : i32
    %c0_i32_1 = arith.constant 0 : i32
    return %arg0, %c0_i32, %c0_i32_0 : i32, i32, i32
  }
  func.func @transform_7(%arg0: i32) -> (i32, i32, i32) {
    %c0_i32 = arith.constant 0 : i32
    %c0_i32_0 = arith.constant 0 : i32
    %c0_i32_1 = arith.constant 0 : i32
    return %arg0, %c0_i32, %c0_i32_0 : i32, i32, i32
  }
}

module attributes {stable_mosaic.version = 11 : i64} {
  func.func @_conv_stage_kernel(%arg0: i32, %arg1: memref<16x128xf32, #tpu.memory_space<vmem>>, %arg2: memref<1x128xf32, #tpu.memory_space<vmem>>, %arg3: memref<1x128xf32, #tpu.memory_space<vmem>>, %arg4: memref<16x128xf32, #tpu.memory_space<vmem>>, %arg5: memref<384x128xf32, #tpu.memory_space<vmem>>, %arg6: memref<1x128xf32, #tpu.memory_space<vmem>>, %arg7: memref<16x128xf32, #tpu.memory_space<vmem>>, %arg8: memref<1x1x128xf32, #tpu.memory_space<vmem>>, %arg9: memref<1x1x128xf32, #tpu.memory_space<vmem>>, %arg10: memref<16x128xf32, #tpu.memory_space<vmem>>) attributes {dimension_semantics = [#tpu.dimension_semantics<parallel>], iteration_bounds = array<i64: 2>, scalar_prefetch = 0 : i64, scratch_operands = 0 : i64, tpu.core_type = #tpu.core_type<tc>, window_params = [{transform_indices = @transform_0, window_bounds = array<i64: 16, 128>}, {pipeline_mode = #tpu.pipeline_mode<synchronous>, transform_indices = @transform_1, window_bounds = array<i64: 1, 128>}, {pipeline_mode = #tpu.pipeline_mode<synchronous>, transform_indices = @transform_2, window_bounds = array<i64: 1, 128>}, {transform_indices = @transform_3, window_bounds = array<i64: 16, 128>}, {pipeline_mode = #tpu.pipeline_mode<synchronous>, transform_indices = @transform_4, window_bounds = array<i64: 384, 128>}, {pipeline_mode = #tpu.pipeline_mode<synchronous>, transform_indices = @transform_5, window_bounds = array<i64: 1, 128>}, {transform_indices = @transform_6, window_bounds = array<i64: 16, 128>}, {transform_indices = @transform_7, window_bounds = array<i64: 1, 1, 128>}, {transform_indices = @transform_8, window_bounds = array<i64: 1, 1, 128>}, {transform_indices = @transform_9, window_bounds = array<i64: 16, 128>}]} {
    %c0 = arith.constant 0 : index
    %c0_0 = arith.constant 0 : index
    %0 = vector.load %arg1[%c0, %c0_0] : memref<16x128xf32, #tpu.memory_space<vmem>>, vector<16x128xf32>
    %c0_1 = arith.constant 0 : index
    %c0_2 = arith.constant 0 : index
    %1 = vector.load %arg2[%c0_1, %c0_2] : memref<1x128xf32, #tpu.memory_space<vmem>>, vector<1x128xf32>
    %2 = vector.broadcast %1 : vector<1x128xf32> to vector<16x128xf32>
    %3 = arith.mulf %0, %2 : vector<16x128xf32>
    %c0_3 = arith.constant 0 : index
    %c0_4 = arith.constant 0 : index
    %4 = vector.load %arg3[%c0_3, %c0_4] : memref<1x128xf32, #tpu.memory_space<vmem>>, vector<1x128xf32>
    %5 = vector.broadcast %4 : vector<1x128xf32> to vector<16x128xf32>
    %6 = arith.addf %3, %5 : vector<16x128xf32>
    %c0_5 = arith.constant 0 : index
    %c0_6 = arith.constant 0 : index
    %7 = vector.load %arg4[%c0_5, %c0_6] : memref<16x128xf32, #tpu.memory_space<vmem>>, vector<16x128xf32>
    %8 = arith.addf %6, %7 : vector<16x128xf32>
    %cst = arith.constant 0.000000e+00 : f32
    %9 = vector.broadcast %cst : f32 to vector<16x128xf32>
    %10 = arith.maximumf %8, %9 : vector<16x128xf32>
    %c0_7 = arith.constant 0 : index
    %c0_8 = arith.constant 0 : index
    %11 = vector.load %arg10[%c0_7, %c0_8] : memref<16x128xf32, #tpu.memory_space<vmem>>, vector<16x128xf32>
    tpu.vector_store %arg10[%c0_7, %c0_8], %10 {strides = array<i32>} : memref<16x128xf32, #tpu.memory_space<vmem>>, vector<16x128xf32>,
    %12 = tpu.iota {dimensions = array<i32: 0>} : vector<16x1xi32>
    %c16_i32 = arith.constant 16 : i32
    %c0_i32 = arith.constant 0 : i32
    %13 = arith.cmpi eq, %c16_i32, %c0_i32 : i32
    %c1_i32 = arith.constant 1 : i32
    %14 = arith.select %13, %c1_i32, %c16_i32 : i32
    %15 = vector.broadcast %14 : i32 to vector<16x1xi32>
    %16 = arith.remsi %12, %15 : vector<16x1xi32>
    %c0_i32_9 = arith.constant 0 : i32
    %17 = vector.broadcast %c0_i32_9 : i32 to vector<16x1xi32>
    %18 = arith.cmpi ne, %16, %17 : vector<16x1xi32>
    %c0_i32_10 = arith.constant 0 : i32
    %19 = vector.broadcast %c0_i32_10 : i32 to vector<16x1xi32>
    %20 = arith.cmpi slt, %16, %19 : vector<16x1xi32>
    %c0_i32_11 = arith.constant 0 : i32
    %21 = arith.cmpi slt, %14, %c0_i32_11 : i32
    %22 = vector.broadcast %21 : i1 to vector<16x1xi1>
    %23 = vector.broadcast %22 : vector<16x1xi1> to vector<16x1xi1>
    %24 = arith.xori %20, %23 : vector<16x1xi1>
    %25 = arith.andi %24, %18 : vector<16x1xi1>
    %26 = vector.broadcast %14 : i32 to vector<16x1xi32>
    %27 = arith.addi %16, %26 : vector<16x1xi32>
    %28 = arith.select %25, %27, %16 : vector<16x1xi1>, vector<16x1xi32>
    %c0_i32_12 = arith.constant 0 : i32
    %29 = vector.broadcast %c0_i32_12 : i32 to vector<16x1xi32>
    %30 = arith.cmpi eq, %28, %29 : vector<16x1xi32>
    %c1_i32_13 = arith.constant 1 : i32
    %31 = tpu.dynamic_rotate %10 by %c1_i32_13 dim 0 : vector<16x128xf32>, i32 -> vector<16x128xf32>
    %cst_14 = arith.constant 0.000000e+00 : f32
    %32 = vector.shape_cast %30 : vector<16x1xi1> to vector<16x1xi1>
    %33 = vector.broadcast %32 : vector<16x1xi1> to vector<16x128xi1>
    %34 = vector.broadcast %cst_14 : f32 to vector<16x128xf32>
    %35 = arith.select %33, %34, %31 : vector<16x128xi1>, vector<16x128xf32>
    %c15_i32 = arith.constant 15 : i32
    %36 = vector.broadcast %c15_i32 : i32 to vector<16x1xi32>
    %37 = arith.cmpi eq, %28, %36 : vector<16x1xi32>
    %c15_i32_15 = arith.constant 15 : i32
    %38 = tpu.dynamic_rotate %10 by %c15_i32_15 dim 0 : vector<16x128xf32>, i32 -> vector<16x128xf32>
    %cst_16 = arith.constant 0.000000e+00 : f32
    %39 = vector.shape_cast %37 : vector<16x1xi1> to vector<16x1xi1>
    %40 = vector.broadcast %39 : vector<16x1xi1> to vector<16x128xi1>
    %41 = vector.broadcast %cst_16 : f32 to vector<16x128xf32>
    %42 = arith.select %40, %41, %38 : vector<16x128xi1>, vector<16x128xf32>
    %43 = tpu.concatenate %35, %10, %42 in 1 : vector<16x128xf32>, vector<16x128xf32>, vector<16x128xf32> -> vector<16x384xf32>
    %c0_17 = arith.constant 0 : index
    %c0_18 = arith.constant 0 : index
    %44 = vector.load %arg5[%c0_17, %c0_18] : memref<384x128xf32, #tpu.memory_space<vmem>>, vector<384x128xf32>
    %cst_19 = arith.constant dense<0.000000e+00> : vector<16x128xf32>
    %45 = tpu.matmul %43, %44, %cst_19 {dimension_numbers = #tpu.dot_dimension_numbers<[1], [0], [0], [1], [0, 0, 1, 1], [], []>} : vector<16x384xf32>, vector<384x128xf32>, vector<16x128xf32> -> vector<16x128xf32>
    %c0_20 = arith.constant 0 : index
    %c0_21 = arith.constant 0 : index
    %46 = vector.load %arg6[%c0_20, %c0_21] : memref<1x128xf32, #tpu.memory_space<vmem>>, vector<1x128xf32>
    %47 = vector.broadcast %46 : vector<1x128xf32> to vector<16x128xf32>
    %48 = arith.addf %45, %47 : vector<16x128xf32>
    %c0_22 = arith.constant 0 : index
    %c0_23 = arith.constant 0 : index
    %49 = vector.load %arg7[%c0_22, %c0_23] : memref<16x128xf32, #tpu.memory_space<vmem>>, vector<16x128xf32>
    tpu.vector_store %arg7[%c0_22, %c0_23], %48 {strides = array<i32>} : memref<16x128xf32, #tpu.memory_space<vmem>>, vector<16x128xf32>,
    %cst_24 = arith.constant dense<0.000000e+00> : vector<128xf32>
    %50 = vector.multi_reduction <add>, %48, %cst_24 [0] : vector<16x128xf32> to vector<128xf32>
    %51 = vector.shape_cast %50 : vector<128xf32> to vector<1x128xf32>
    %cst_25 = arith.constant 6.250000e-02 : f32
    %52 = vector.broadcast %cst_25 : f32 to vector<1x128xf32>
    %53 = arith.mulf %51, %52 : vector<1x128xf32>
    %54 = vector.broadcast %53 : vector<1x128xf32> to vector<16x128xf32>
    %55 = arith.subf %48, %54 : vector<16x128xf32>
    %56 = arith.mulf %55, %55 : vector<16x128xf32>
    %cst_26 = arith.constant dense<0.000000e+00> : vector<128xf32>
    %57 = vector.multi_reduction <add>, %56, %cst_26 [0] : vector<16x128xf32> to vector<128xf32>
    %58 = vector.shape_cast %57 : vector<128xf32> to vector<1x128xf32>
    %59 = vector.shape_cast %51 : vector<1x128xf32> to vector<1x1x128xf32>
    %c0_27 = arith.constant 0 : index
    %c0_28 = arith.constant 0 : index
    %c0_29 = arith.constant 0 : index
    %60 = vector.load %arg8[%c0_27, %c0_28, %c0_29] : memref<1x1x128xf32, #tpu.memory_space<vmem>>, vector<1x1x128xf32>
    tpu.vector_store %arg8[%c0_27, %c0_28, %c0_29], %59 {strides = array<i32>} : memref<1x1x128xf32, #tpu.memory_space<vmem>>, vector<1x1x128xf32>,
    %61 = vector.shape_cast %58 : vector<1x128xf32> to vector<1x1x128xf32>
    %c0_30 = arith.constant 0 : index
    %c0_31 = arith.constant 0 : index
    %c0_32 = arith.constant 0 : index
    %62 = vector.load %arg9[%c0_30, %c0_31, %c0_32] : memref<1x1x128xf32, #tpu.memory_space<vmem>>, vector<1x1x128xf32>
    tpu.vector_store %arg9[%c0_30, %c0_31, %c0_32], %61 {strides = array<i32>} : memref<1x1x128xf32, #tpu.memory_space<vmem>>, vector<1x1x128xf32>,
    return
  }
  func.func @transform_0(%arg0: i32) -> (i32, i32) {
    %c0_i32 = arith.constant 0 : i32
    %c0_i32_0 = arith.constant 0 : i32
    return %arg0, %c0_i32 : i32, i32
  }
  func.func @transform_1(%arg0: i32) -> (i32, i32) {
    %c0_i32 = arith.constant 0 : i32
    %c0_i32_0 = arith.constant 0 : i32
    %c0_i32_1 = arith.constant 0 : i32
    return %c0_i32, %c0_i32_0 : i32, i32
  }
  func.func @transform_2(%arg0: i32) -> (i32, i32) {
    %c0_i32 = arith.constant 0 : i32
    %c0_i32_0 = arith.constant 0 : i32
    %c0_i32_1 = arith.constant 0 : i32
    return %c0_i32, %c0_i32_0 : i32, i32
  }
  func.func @transform_3(%arg0: i32) -> (i32, i32) {
    %c0_i32 = arith.constant 0 : i32
    %c0_i32_0 = arith.constant 0 : i32
    return %arg0, %c0_i32 : i32, i32
  }
  func.func @transform_4(%arg0: i32) -> (i32, i32) {
    %c0_i32 = arith.constant 0 : i32
    %c0_i32_0 = arith.constant 0 : i32
    %c0_i32_1 = arith.constant 0 : i32
    return %c0_i32, %c0_i32_0 : i32, i32
  }
  func.func @transform_5(%arg0: i32) -> (i32, i32) {
    %c0_i32 = arith.constant 0 : i32
    %c0_i32_0 = arith.constant 0 : i32
    %c0_i32_1 = arith.constant 0 : i32
    return %c0_i32, %c0_i32_0 : i32, i32
  }
  func.func @transform_6(%arg0: i32) -> (i32, i32) {
    %c0_i32 = arith.constant 0 : i32
    %c0_i32_0 = arith.constant 0 : i32
    return %arg0, %c0_i32 : i32, i32
  }
  func.func @transform_7(%arg0: i32) -> (i32, i32, i32) {
    %c0_i32 = arith.constant 0 : i32
    %c0_i32_0 = arith.constant 0 : i32
    %c0_i32_1 = arith.constant 0 : i32
    return %arg0, %c0_i32, %c0_i32_0 : i32, i32, i32
  }
  func.func @transform_8(%arg0: i32) -> (i32, i32, i32) {
    %c0_i32 = arith.constant 0 : i32
    %c0_i32_0 = arith.constant 0 : i32
    %c0_i32_1 = arith.constant 0 : i32
    return %arg0, %c0_i32, %c0_i32_0 : i32, i32, i32
  }
  func.func @transform_9(%arg0: i32) -> (i32, i32) {
    %c0_i32 = arith.constant 0 : i32
    %c0_i32_0 = arith.constant 0 : i32
    return %arg0, %c0_i32 : i32, i32
  }
}

module attributes {stable_mosaic.version = 11 : i64} {
  func.func @_bn_skip_relu_kernel(%arg0: i32, %arg1: memref<16x128xf32, #tpu.memory_space<vmem>>, %arg2: memref<1x128xf32, #tpu.memory_space<vmem>>, %arg3: memref<1x128xf32, #tpu.memory_space<vmem>>, %arg4: memref<16x128xf32, #tpu.memory_space<vmem>>, %arg5: memref<16x128xf32, #tpu.memory_space<vmem>>) attributes {dimension_semantics = [#tpu.dimension_semantics<parallel>], iteration_bounds = array<i64: 2>, scalar_prefetch = 0 : i64, scratch_operands = 0 : i64, tpu.core_type = #tpu.core_type<tc>, window_params = [{transform_indices = @transform_0, window_bounds = array<i64: 16, 128>}, {pipeline_mode = #tpu.pipeline_mode<synchronous>, transform_indices = @transform_1, window_bounds = array<i64: 1, 128>}, {pipeline_mode = #tpu.pipeline_mode<synchronous>, transform_indices = @transform_2, window_bounds = array<i64: 1, 128>}, {transform_indices = @transform_3, window_bounds = array<i64: 16, 128>}, {transform_indices = @transform_4, window_bounds = array<i64: 16, 128>}]} {
    %c0 = arith.constant 0 : index
    %c0_0 = arith.constant 0 : index
    %0 = vector.load %arg1[%c0, %c0_0] : memref<16x128xf32, #tpu.memory_space<vmem>>, vector<16x128xf32>
    %c0_1 = arith.constant 0 : index
    %c0_2 = arith.constant 0 : index
    %1 = vector.load %arg2[%c0_1, %c0_2] : memref<1x128xf32, #tpu.memory_space<vmem>>, vector<1x128xf32>
    %2 = vector.broadcast %1 : vector<1x128xf32> to vector<16x128xf32>
    %3 = arith.mulf %0, %2 : vector<16x128xf32>
    %c0_3 = arith.constant 0 : index
    %c0_4 = arith.constant 0 : index
    %4 = vector.load %arg3[%c0_3, %c0_4] : memref<1x128xf32, #tpu.memory_space<vmem>>, vector<1x128xf32>
    %5 = vector.broadcast %4 : vector<1x128xf32> to vector<16x128xf32>
    %6 = arith.addf %3, %5 : vector<16x128xf32>
    %c0_5 = arith.constant 0 : index
    %c0_6 = arith.constant 0 : index
    %7 = vector.load %arg4[%c0_5, %c0_6] : memref<16x128xf32, #tpu.memory_space<vmem>>, vector<16x128xf32>
    %8 = arith.addf %6, %7 : vector<16x128xf32>
    %cst = arith.constant 0.000000e+00 : f32
    %9 = vector.broadcast %cst : f32 to vector<16x128xf32>
    %10 = arith.maximumf %8, %9 : vector<16x128xf32>
    %c0_7 = arith.constant 0 : index
    %c0_8 = arith.constant 0 : index
    %11 = vector.load %arg5[%c0_7, %c0_8] : memref<16x128xf32, #tpu.memory_space<vmem>>, vector<16x128xf32>
    tpu.vector_store %arg5[%c0_7, %c0_8], %10 {strides = array<i32>} : memref<16x128xf32, #tpu.memory_space<vmem>>, vector<16x128xf32>,
    return
  }
  func.func @transform_0(%arg0: i32) -> (i32, i32) {
    %c0_i32 = arith.constant 0 : i32
    %c0_i32_0 = arith.constant 0 : i32
    return %arg0, %c0_i32 : i32, i32
  }
  func.func @transform_1(%arg0: i32) -> (i32, i32) {
    %c0_i32 = arith.constant 0 : i32
    %c0_i32_0 = arith.constant 0 : i32
    %c0_i32_1 = arith.constant 0 : i32
    return %c0_i32, %c0_i32_0 : i32, i32
  }
  func.func @transform_2(%arg0: i32) -> (i32, i32) {
    %c0_i32 = arith.constant 0 : i32
    %c0_i32_0 = arith.constant 0 : i32
    %c0_i32_1 = arith.constant 0 : i32
    return %c0_i32, %c0_i32_0 : i32, i32
  }
  func.func @transform_3(%arg0: i32) -> (i32, i32) {
    %c0_i32 = arith.constant 0 : i32
    %c0_i32_0 = arith.constant 0 : i32
    return %arg0, %c0_i32 : i32, i32
  }
  func.func @transform_4(%arg0: i32) -> (i32, i32) {
    %c0_i32 = arith.constant 0 : i32
    %c0_i32_0 = arith.constant 0 : i32
    return %arg0, %c0_i32 : i32, i32
  }
}

</mosaic_0001>

<bundles_post_ra>
// kernel: tile.63
= control target key start
LH: loop header
LB: loop body
LE: loop exit
PB: predicated region body
PF: predicated region fallthrough
CT: control target
= control target key end

     0   :  { %s28_s0 = inlined_call_operand.vmem [shape: f32[8], index: 0, kind: input, shape index: {}]   ;;  %s29_s1 = inlined_call_operand.vmem [shape: f32[16,8], index: 1, kind: output, shape index: {}]  }
   0x1   :  { %v4_v0 = vld [vmem:[%s28_s0] ss:$0 sm:$0xff] }
   0x2   :  { %5 = vst [vmem:[%s29_s1] sm:$0xff] %v4_v0  ;;  %8 = vst [vmem:[%s29_s1 + $0x8] sm:$0xff] %v4_v0 }

// kernel: tile.64
= control target key start
LH: loop header
LB: loop body
LE: loop exit
PB: predicated region body
PF: predicated region fallthrough
CT: control target
= control target key end

     0   :  { %s131_s10 = smov 120   ;;  %s132_s11 = smov 104   ;;  %vm3_vm0 = vcmask 64512   ;;  %vm9_vm1 = vcmask 1048512   ;;  %vm15_vm2 = vcmask 982912   ;;  %vm21_vm3 = vcmask 917312   ;;  %s207_s0 = inlined_call_operand.vmem [shape: f32[16,8], index: 0, kind: input, shape index: {}]   ;;  %s208_s1 = inlined_call_operand.vmem [shape: f32[1,128], index: 1, kind: output, shape index: {}]  }
   0x1   :  { %v101_v0 = vld [vmem:[%s207_s0 + $0xf] sm:$0x1]   ;;  %v103_v1 = vld [vmem:[%s207_s0 + $0xd] sm:$0x1]   ;;  %v102_v2 = vld [vmem:[%s207_s0 + $0xe] sm:$0x1]  }
   0x2   :  { %7 = vrot.lane.b32.xlu0 %v101_v0, %s131_s10  ;;  %19 = vrot.lane.b32.xlu1 %v103_v1, %s132_s11  ;;  %v104_v3 = vld [vmem:[%s207_s0 + $0xc] sm:$0x1]   ;;  %s133_s16 = smov 112   ;;  %s134_s17 = smov 96   ;;  %v105_v4 = vld [vmem:[%s207_s0 + $0xb] sm:$0x1]  }
   0x3   :  { %v106_v5 = vld [vmem:[%s207_s0 + $0xa] sm:$0x1]   ;;  %v2_v6 = vld [vmem:[%s207_s0] sm:$0x1]   ;;  %s135_s24 = smov 88   ;;  %s136_s25 = smov 80  }
   0x4   :  { %4 = vst.msk [vmem:[#allocation0] sm:$0x1] %vm3_vm0, %v2_v6   ;;  %v107_v7 = vld [vmem:[%s207_s0 + $0x9] sm:$0x1]   ;;  %v108_v8 = vld [vmem:[%s207_s0 + $0x8] sm:$0x1]  }
   0x5   :  { %s137_s30 = smov 72   ;;  %s138_s2 = smov 64   ;;  %v109_v9 = vld [vmem:[%s207_s0 + $0x7] sm:$0x1]   ;;  %v110_v10 = vld [vmem:[%s207_s0 + $0x6] sm:$0x1]  }
   0x6   :  { %13 = vrot.lane.b32.xlu0 %v102_v2, %s133_s16  ;;  %25 = vrot.lane.b32.xlu1 %v104_v3, %s134_s17  ;;  %s139_s7 = smov 56   ;;  %s140_s8 = smov 48   ;;  %v111_v11 = vld [vmem:[%s207_s0 + $0x5] sm:$0x1]   ;;  %v112_v12 = vld [vmem:[%s207_s0 + $0x4] sm:$0x1]  }
   0x7   :  { %s141_s13 = smov 40   ;;  %s142_s14 = smov 32   ;;  %v113_v13 = vld [vmem:[%s207_s0 + $0x3] sm:$0x1]   ;;  %v114_v14 = vld [vmem:[%s207_s0 + $0x2] sm:$0x1]  }
   0x8   :  { %s143_s19 = smov 24   ;;  %s144_s20 = smov 16   ;;  %v115_v15 = vld [vmem:[%s207_s0 + $0x1] sm:$0x1]   ;;  %vm27_vm4 = vcmask 851712   ;;  %vm33_vm5 = vcmask 786112  }
   0x9   :  { %s145_s0 = smov 8   ;;  %vm39_vm6 = vcmask 720512   ;;  %vm45_vm7 = vcmask 654912   ;;  %vm51_vm8 = vcmask 589312   ;;  %vm57_vm9 = vcmask 523712  }
   0xa   :  { %31 = vrot.lane.b32.xlu0 %v105_v4, %s135_s24  ;;  %37 = vrot.lane.b32.xlu1 %v106_v5, %s136_s25  ;;  %vm63_vm10 = vcmask 458112   ;;  %vm69_vm11 = vcmask 392512   ;;  %vm75_vm12 = vcmask 326912   ;;  %vm81_vm13 = vcmask 261312  }
   0xb   :  { %vm87_vm14 = vcmask 195712   ;;  %vm93_vm15 = vcmask 130112  }
   0xe   :  { %43 = vrot.lane.b32.xlu0 %v107_v7, %s137_s30  ;;  %49 = vrot.lane.b32.xlu1 %v108_v8, %s138_s2 }
  0x12   :  { %55 = vrot.lane.b32.xlu0 %v109_v9, %s139_s7  ;;  %61 = vrot.lane.b32.xlu1 %v110_v10, %s140_s8 }
  0x16   :  { %67 = vrot.lane.b32.xlu0 %v111_v11, %s141_s13  ;;  %73 = vrot.lane.b32.xlu1 %v112_v12, %s142_s14 }
  0x1a   :  { %79 = vrot.lane.b32.xlu0 %v113_v13, %s143_s19  ;;  %85 = vrot.lane.b32.xlu1 %v114_v14, %s144_s20 }
  0x1e   :  { %91 = vrot.lane.b32.xlu0 %v115_v15, %s145_s0 }
  0x74   :  { %v8_v16 = vpop.permute.xlu0 %7   ;;  %v20_v17 = vpop.permute.xlu1 %19  }
  0x75   :  { %10 = vst.msk [vmem:[#allocation0] sm:$0x1] %vm9_vm1, %v8_v16  }
  0x78   :  { %v14_v18 = vpop.permute.xlu0 %13   ;;  %v26_v19 = vpop.permute.xlu1 %25  }
  0x79   :  { %16 = vst.msk [vmem:[#allocation0] sm:$0x1] %vm15_vm2, %v14_v18  }
  0x7a   :  { %22 = vst.msk [vmem:[#allocation0] sm:$0x1] %vm21_vm3, %v20_v17  }
  0x7b   :  { %28 = vst.msk [vmem:[#allocation0] sm:$0x1] %vm27_vm4, %v26_v19  }
  0x7c   :  { %v32_v20 = vpop.permute.xlu0 %31   ;;  %v38_v21 = vpop.permute.xlu1 %37  }
  0x7d   :  { %34 = vst.msk [vmem:[#allocation0] sm:$0x1] %vm33_vm5, %v32_v20  }
  0x7e   :  { %40 = vst.msk [vmem:[#allocation0] sm:$0x1] %vm39_vm6, %v38_v21  }
  0x80   :  { %v44_v22 = vpop.permute.xlu0 %43   ;;  %v50_v23 = vpop.permute.xlu1 %49  }
  0x81   :  { %46 = vst.msk [vmem:[#allocation0] sm:$0x1] %vm45_vm7, %v44_v22  }
  0x82   :  { %52 = vst.msk [vmem:[#allocation0] sm:$0x1] %vm51_vm8, %v50_v23  }
  0x84   :  { %v56_v24 = vpop.permute.xlu0 %55   ;;  %v62_v25 = vpop.permute.xlu1 %61  }
  0x85   :  { %58 = vst.msk [vmem:[#allocation0] sm:$0x1] %vm57_vm9, %v56_v24  }
  0x86   :  { %64 = vst.msk [vmem:[#allocation0] sm:$0x1] %vm63_vm10, %v62_v25  }
  0x88   :  { %v68_v26 = vpop.permute.xlu0 %67   ;;  %v74_v27 = vpop.permute.xlu1 %73  }
  0x89   :  { %70 = vst.msk [vmem:[#allocation0] sm:$0x1] %vm69_vm11, %v68_v26  }
  0x8a   :  { %76 = vst.msk [vmem:[#allocation0] sm:$0x1] %vm75_vm12, %v74_v27  }
  0x8c   :  { %v80_v28 = vpop.permute.xlu0 %79   ;;  %v86_v29 = vpop.permute.xlu1 %85  }
  0x8d   :  { %82 = vst.msk [vmem:[#allocation0] sm:$0x1] %vm81_vm13, %v80_v28  }
  0x8e   :  { %88 = vst.msk [vmem:[#allocation0] sm:$0x1] %vm87_vm14, %v86_v29  }
  0x90   :  { %v92_v30 = vpop.permute.xlu0 %91  }
  0x91   :  { %94 = vst.msk [vmem:[#allocation0] sm:$0x1] %vm93_vm15, %v92_v30  }
  0x98   :  { %v98_v31 = vld [vmem:[#allocation0] sm:$0x1] }
  0x99   :  { %100 = vst [vmem:[%s208_s1] sm:$0x1] %v98_v31 }

// kernel: residual_block.5
= control target key start
LH: loop header
LB: loop body
LE: loop exit
PB: predicated region body
PF: predicated region fallthrough
CT: control target
= control target key end

     0   :  { %s911_s18 = smov 0   ;;  %s1047_s0 = inlined_call_operand.vmem [shape: f32[32,64], index: 0, kind: input, shape index: {}]   ;;  %s1048_s1 = inlined_call_operand.vmem [shape: f32[192,128], index: 1, kind: input, shape index: {}]   ;;  %s1049_s2 = inlined_call_operand.vmem [shape: f32[1,128], index: 2, kind: input, shape index: {}]   ;;  %s1050_s3 = inlined_call_operand.vmem [shape: f32[32,128], index: 3, kind: output, shape index: {0}]   ;;  %s1051_s4 = inlined_call_operand.vmem [shape: f32[2,1,128], index: 4, kind: output, shape index: {1}]   ;;  %s1052_s5 = inlined_call_operand.vmem [shape: f32[2,1,128], index: 5, kind: output, shape index: {2}]  }
   0x1 LB: > { %s917_s19 = sadd.s32 4294967295, %s879_s18   ;;  %p712_p0 = scmp.ge.s32.totalorder %s879_s18, 1  ;;  %s879_s18 = sphi %s911_s18, %s16_s18  }
   0x2   : > { %p193_p1 = scmp.lt.s32.totalorder %s879_s18, 3 }
   0x4   : > { %p194_p2 = pnand %p712_p0, %p193_p1 }
   0x5   : > { %v300_v0 = vld [vmem:[%s1048_s1] sm:$0xff] (!%p194_p2)  ;;  %v301_v1 = vld [vmem:[%s1048_s1 + $0x8] sm:$0xff] (!%p194_p2)  ;;  %v302_v2 = vld [vmem:[%s1048_s1 + $0x10] sm:$0xff] (!%p194_p2)  ;;  %s713_s26 = sshll.u32 (!%p194_p2), %s917_s19, 1  ;;  %v247_v3 = vlaneseq (!%p194_p2)  ;;  %vm316_vm2 = vcmask (!%p194_p2), 523264   ;;  %p239_p4 = scmp.lt.s32.totalorder (!%p194_p2), %s917_s19, 1 }
   0x6   : > { %197 = sbr.rel (%p194_p2) target bundleno = 292 (0x124), region = 32  ;;  %v829_v4 = vpack.c.bf16 (!%p194_p2), %v301_v1, %v300_v0  ;;  %v303_v5 = vld [vmem:[%s1048_s1 + $0x18] sm:$0xff] (!%p194_p2)  ;;  %p228_p3 = scmp.lt.s32.totalorder (!%p194_p2), %s713_s26, 3  ;;  %v304_v7 = vld [vmem:[%s1048_s1 + $0x20] sm:$0xff] (!%p194_p2)  ;;  %v305_v8 = vld [vmem:[%s1048_s1 + $0x28] sm:$0xff] (!%p194_p2) }
   0x7   : > { %v833_v6 = vpack.c.bf16 (!%p194_p2), %v303_v5, %v302_v2  ;;  %v308_v9 = vld [vmem:[%s1048_s1 + $0x40] sm:$0xff] (!%p194_p2)  ;;  %v943_v10 = vshrl.u32 (!%p194_p2), %v247_v3, 7  ;;  %v309_v11 = vld [vmem:[%s1048_s1 + $0x48] sm:$0xff] (!%p194_p2)  ;;  %v310_v14 = vld [vmem:[%s1048_s1 + $0x50] sm:$0xff] (!%p194_p2)  ;;  %v837_v16 = vpack.c.bf16 (!%p194_p2), %v305_v8, %v304_v7 }
   0x8   : > { %830 = vmatprep.subr.bf16.mxu0 (!%p194_p2), %v829_v4  ;;  %v813_v12 = vpack.c.bf16 (!%p194_p2), %v309_v11, %v308_v9  ;;  %v311_v15 = vld [vmem:[%s1048_s1 + $0x58] sm:$0xff] (!%p194_p2)  ;;  %v306_v17 = vld [vmem:[%s1048_s1 + $0x30] sm:$0xff] (!%p194_p2)  ;;  %v312_v20 = vld [vmem:[%s1048_s1 + $0x60] sm:$0xff] (!%p194_p2) }
   0x9   : > { %832 = vmatpush3.bf16.msra.mxu0 (!%p194_p2), %v829_v4  ;;  %v254_v13 = vand.u32 (!%p194_p2), 15, %v943_v10  ;;  %v817_v18 = vpack.c.bf16 (!%p194_p2), %v311_v15, %v310_v14  ;;  %v307_v19 = vld [vmem:[%s1048_s1 + $0x38] sm:$0xff] (!%p194_p2)  ;;  %v313_v21 = vld [vmem:[%s1048_s1 + $0x68] sm:$0xff] (!%p194_p2)  ;;  %vm278_vm0 = vcmp.lt.s32.totalorder (!%p194_p2), %v943_v10, 1  ;;  %v314_v29 = vld [vmem:[%s1048_s1 + $0x70] sm:$0xff] (!%p194_p2)  ;;  %vm291_vm3 = vcmp.lt.s32.totalorder (!%p194_p2), %v943_v10, 7 }
   0xa   : > { %834 = vmatprep.subr.bf16.mxu0 (!%p194_p2), %v833_v6  ;;  %814 = vmatprep.subr.bf16.mxu1 (!%p194_p2), %v813_v12  ;;  %v841_v27 = vpack.c.bf16 (!%p194_p2), %v307_v19, %v306_v17  ;;  %v821_v28 = vpack.c.bf16 (!%p194_p2), %v313_v21, %v312_v20  ;;  %v315_v30 = vld [vmem:[%s1048_s1 + $0x78] sm:$0xff] (!%p194_p2)  ;;  %v479_v32 = vld [vmem:[%s1048_s1 + $0x80] sm:$0xff] (!%p194_p2)  ;;  %v480_v33 = vld [vmem:[%s1048_s1 + $0x88] sm:$0xff] (!%p194_p2)  ;;  %v249_v47 = vadd.s32 (!%p194_p2), 8, %v943_v10 }
   0xb   : > { %816 = vmatpush3.bf16.msra.mxu1 (!%p194_p2), %v813_v12  ;;  %vm976_vm1 = vcmp.eq.s32.totalorder (!%p194_p2), %v254_v13, 0  ;;  %v825_v35 = vpack.c.bf16 (!%p194_p2), %v315_v30, %v314_v29  ;;  %v845_v36 = vpack.c.bf16 (!%p194_p2), %v480_v33, %v479_v32  ;;  %v481_v39 = vld [vmem:[%s1048_s1 + $0x90] sm:$0xff] (!%p194_p2)  ;;  %v482_v40 = vld [vmem:[%s1048_s1 + $0x98] sm:$0xff] (!%p194_p2)  ;;  %v483_v44 = vld [vmem:[%s1048_s1 + $0xa0] sm:$0xff] (!%p194_p2) }
   0xc   : > { %818 = vmatprep.subr.bf16.mxu1 (!%p194_p2), %v817_v18  ;;  %v849_v42 = vpack.c.bf16 (!%p194_p2), %v482_v40, %v481_v39  ;;  %v484_v45 = vld [vmem:[%s1048_s1 + $0xa8] sm:$0xff] (!%p194_p2)  ;;  %v485_v48 = vld [vmem:[%s1048_s1 + $0xb0] sm:$0xff] (!%p194_p2)  ;;  %v486_v49 = vld [vmem:[%s1048_s1 + $0xb8] sm:$0xff] (!%p194_p2)  ;;  %v261_v51 = vand.u32 (!%p194_p2), 15, %v249_v47 }
   0xd   : > { %s1056_s26 = smov (!%p228_p3, %s713_s26), 3  ;;  %836 = vmatpush3.bf16.msra.mxu0 %v833_v6  ;;  %v853_v46 = vpack.c.bf16 %v484_v45, %v483_v44  ;;  %v857_v50 = vpack.c.bf16 %v486_v49, %v485_v48  ;;  %v723_v57 = vld [vmem:[%s1049_s2] ss:$0 sm:$0xff]  ;;  %s1058_s19 = smov (!%p239_p4, %s917_s19), 1 }
   0xe   : > { %s714_s20 = sshll.u32 %s1056_s26, 3  ;;  %838 = vmatprep.subr.bf16.mxu0 %v837_v16  ;;  %vm288_vm4 = vcmp.eq.s32.totalorder %v261_v51, 15  ;;  %s241_s12 = scalar_lea.vmem %s1051_s4, %s1058_s19 }
   0xf   : > { %s231_s25 = scalar_lea.vmem %s1047_s0, %s714_s20  ;;  %820 = vmatpush3.bf16.msra.mxu1 %v817_v18  ;;  %s237_s9 = scalar_lea.vmem %s1050_s3, %s714_s20 }
  0x10   : > { %v245_v22 = vld [vmem:[%s231_s25] sm:$0xff]  ;;  %v246_v23 = vld [vmem:[%s231_s25 + $0x8] sm:$0xff]  ;;  %822 = vmatprep.subr.bf16.mxu1 %v821_v28  ;;  %s244_s13 = scalar_lea.vmem %s1052_s5, %s1058_s19 }
  0x11   : > { %v276_v25 = vrot.slane %v245_v22, 7  ;;  %v277_v26 = vrot.slane %v246_v23, 7  ;;  %772 = vmatprep.mubr.msk.f32.mxu1 %vm316_vm2, %v245_v22  ;;  %840 = vmatpush3.bf16.msra.mxu0 %v837_v16  ;;  %v289_v37 = vrot.slane %v245_v22, 1  ;;  %v290_v38 = vrot.slane %v246_v23, 1 }
  0x12   : > { %842 = vmatprep.subr.bf16.mxu0 %v841_v27 }
  0x13   : > { %v280_v31 = vsel %vm278_vm0, %v277_v26, %v276_v25  ;;  %824 = vmatpush3.bf16.msra.mxu1 %v821_v28  ;;  %v279_v41 = vsel %vm278_vm0, %v276_v25, %v277_v26  ;;  %v292_v43 = vsel %vm291_vm3, %v289_v37, %v290_v38  ;;  %v293_v52 = vsel %vm291_vm3, %v290_v38, %v289_v37 }
  0x14   : > { %v285_v34 = vsel %vm976_vm1, 0.0, %v280_v31  ;;  %826 = vmatprep.subr.bf16.mxu1 %v825_v35  ;;  %v299_v53 = vsel %vm288_vm4, 0.0, %v293_v52 }
  0x15   : > { %791 = vmatprep.mubr.msk.f32.mxu0 %vm316_vm2, %v285_v34  ;;  %844 = vmatpush3.bf16.msra.mxu0 %v841_v27 }
  0x16   : > { %846 = vmatprep.subr.bf16.mxu0 %v845_v36 }
  0x17   : > { %828 = vmatpush3.bf16.msra.mxu1 %v825_v35 }
  0x18   : > { %792 = vmatmul.mubr.msk.f32.vlgmr.msra.gmra.mrb[0].mxu0 %vm316_vm2, %v279_v41 }
  0x19   : > { %848 = vmatpush3.bf16.msra.mxu0 %v845_v36  ;;  %810 = vmatprep.mubr.msk.f32.mxu0 %vm316_vm2, %v292_v43 }
  0x1a   : > { %850 = vmatprep.subr.bf16.mxu0 %v849_v42  ;;  %773 = vmatmul.mubr.msk.f32.vlgmr.msra.gmra.mrb[0].mxu1 %vm316_vm2, %v246_v23 }
  0x1d   : > { %852 = vmatpush3.bf16.msra.mxu0 %v849_v42 }
  0x1e   : > { %854 = vmatprep.subr.bf16.mxu0 %v853_v46 }
  0x21   : > { %856 = vmatpush3.bf16.msra.mxu0 %v853_v46 }
  0x22   : > { %858 = vmatprep.subr.bf16.mxu0 %v857_v50 }
  0x25   : > { %860 = vmatpush3.bf16.msra.mxu0 %v857_v50 }
  0x28   : > { %811 = vmatmul.mubr.msk.f32.vlgmr.msra.gmra.mrb[0].mxu0 %vm316_vm2, %v299_v53 }
  0xed   : > { %v774_v54 = vpop.f32.mrb[0].mxu1 }
  0xee   : > { %v389_v55 = vpop.f32.mrb[1].mxu1 }
  0xfb   : > { %v812_v56 = vpop.f32.mrb[0].mxu0 }
  0xfc   : > { %v861_v58 = vadd.f32 %v812_v56, %v774_v54  ;;  %v559_v59 = vpop.f32.mrb[1].mxu0 }
  0xfd   : > { %v862_v60 = vadd.f32 %v559_v59, %v389_v55 }
  0xfe   : > { %v578_v61 = vadd.f32 %v861_v58, %v723_v57 }
  0xff   : > { %v577_v62 = vadd.f32 %v862_v60, %v723_v57 }
 0x100   : > { %580 = vst [vmem:[%s237_s9 + $0x8] sm:$0xff] %v578_v61 }
 0x101   : > { %579 = vst [vmem:[%s237_s9] sm:$0xff] %v577_v62  ;;  %v581_v63 = vadd.f32 %v578_v61, %v577_v62 }
 0x103   : > { %v582_v0 = vrot.slane %v581_v63, 4 }
 0x105   : > { %v583_v1 = vadd.f32 %v582_v0, %v581_v63 }
 0x107   : > { %v584_v2 = vrot.slane %v583_v1, 2 }
 0x109   : > { %v585_v3 = vadd.f32 %v584_v2, %v583_v1 }
 0x10b   : > { %v586_v4 = vrot.slane %v585_v3, 1 }
 0x10d   : > { %v587_v5 = vadd.f32 %v586_v4, %v585_v3 }
 0x10f   : > { %v588_v6 = vmul.f32 0.0625, %v587_v5  ;;  %600 = vst [vmem:[%s241_s12] sm:$0x1] %v587_v5 }
 0x111   : > { %v589_v7 = vsub.f32 %v577_v62, %v588_v6  ;;  %v590_v8 = vsub.f32 %v578_v61, %v588_v6 }
 0x113   : > { %v591_v9 = vmul.f32 %v589_v7, %v589_v7  ;;  %v592_v10 = vmul.f32 %v590_v8, %v590_v8 }
 0x115   : > { %v593_v11 = vadd.f32 %v592_v10, %v591_v9 }
 0x117   : > { %v594_v12 = vrot.slane %v593_v11, 4 }
 0x119   : > { %v595_v13 = vadd.f32 %v594_v12, %v593_v11 }
 0x11b   : > { %v596_v14 = vrot.slane %v595_v13, 2 }
 0x11d   : > { %v597_v15 = vadd.f32 %v596_v14, %v595_v13 }
 0x11f   : > { %v598_v16 = vrot.slane %v597_v15, 1 }
 0x121   : > { %v599_v17 = vadd.f32 %v598_v16, %v597_v15 }
 0x123   : > { %601 = vst [vmem:[%s244_s13] sm:$0x1] %v599_v17 }
 0x124 PF: > { %s16_s18 = sadd.s32 1, %s879_s18  }
 0x125   : > { %p13_p5 = scmp.ge.s32.totalorder %s16_s18, 4  }
 0x127   :  { %15 = sbr.rel (!%p13_p5) target bundleno = 1 (0x1), region = 86 }

// kernel: residual_block.6
= control target key start
LH: loop header
LB: loop body
LE: loop exit
PB: predicated region body
PF: predicated region fallthrough
CT: control target
= control target key end

     0   :  { %s939_s24 = smov 0   ;;  %s1135_s0 = inlined_call_operand.vmem [shape: f32[32,128], index: 0, kind: input, shape index: {}]   ;;  %s1136_s1 = inlined_call_operand.vmem [shape: f32[1,128], index: 1, kind: input, shape index: {}]   ;;  %s1137_s2 = inlined_call_operand.vmem [shape: f32[1,128], index: 2, kind: input, shape index: {}]   ;;  %s1138_s3 = inlined_call_operand.vmem [shape: f32[384,128], index: 3, kind: input, shape index: {}]   ;;  %s1139_s4 = inlined_call_operand.vmem [shape: f32[1,128], index: 4, kind: input, shape index: {}]   ;;  %s1140_s5 = inlined_call_operand.vmem [shape: f32[32,128], index: 5, kind: output, shape index: {0}]   ;;  %s1141_s6 = inlined_call_operand.vmem [shape: f32[2,1,128], index: 6, kind: output, shape index: {1}]   ;;  %s1142_s7 = inlined_call_operand.vmem [shape: f32[2,1,128], index: 7, kind: output, shape index: {2}]  }
   0x1 LB: > { %s945_s25 = sadd.s32 4294967295, %s897_s24   ;;  %p712_p0 = scmp.ge.s32.totalorder %s897_s24, 1  ;;  %s897_s24 = sphi %s939_s24, %s18_s24  }
   0x2   : > { %p243_p1 = scmp.lt.s32.totalorder %s897_s24, 3 }
   0x4   : > { %p244_p2 = pnand %p712_p0, %p243_p1 }
   0x5   : > { %v390_v0 = vld [vmem:[%s1138_s3 + $0x80] sm:$0xff] (!%p244_p2)  ;;  %v391_v1 = vld [vmem:[%s1138_s3 + $0x88] sm:$0xff] (!%p244_p2)  ;;  %s713_s9 = sshll.u32 (!%p244_p2), %s945_s25, 1  ;;  %v392_v5 = vld [vmem:[%s1138_s3 + $0x90] sm:$0xff] (!%p244_p2)  ;;  %v321_v53 = vlaneseq (!%p244_p2)  ;;  %p293_p4 = scmp.lt.s32.totalorder (!%p244_p2), %s945_s25, 1 }
   0x6   : > { %247 = sbr.rel (%p244_p2) target bundleno = 298 (0x12a), region = 40  ;;  %v374_v2 = vld [vmem:[%s1138_s3] sm:$0xff] (!%p244_p2)  ;;  %v819_v3 = vpack.c.bf16 (!%p244_p2), %v391_v1, %v390_v0  ;;  %v375_v4 = vld [vmem:[%s1138_s3 + $0x8] sm:$0xff] (!%p244_p2)  ;;  %v393_v6 = vld [vmem:[%s1138_s3 + $0x98] sm:$0xff] (!%p244_p2)  ;;  %p968_p3 = scmp.lt.s32.totalorder (!%p244_p2), %s713_s9, 3 }
   0x7   : > { %v821_v7 = vpack.c.bf16 (!%p244_p2), %v375_v4, %v374_v2  ;;  %v823_v8 = vpack.c.bf16 (!%p244_p2), %v393_v6, %v392_v5  ;;  %v406_v9 = vld [vmem:[%s1138_s3 + $0x100] sm:$0xff] (!%p244_p2)  ;;  %v407_v10 = vld [vmem:[%s1138_s3 + $0x108] sm:$0xff] (!%p244_p2)  ;;  %v376_v11 = vld [vmem:[%s1138_s3 + $0x10] sm:$0xff] (!%p244_p2) }
   0x8   : > { %820 = vmatprep.subr.bf16.mxu0 (!%p244_p2), %v819_v3  ;;  %v851_v12 = vpack.c.bf16 (!%p244_p2), %v407_v10, %v406_v9  ;;  %v377_v13 = vld [vmem:[%s1138_s3 + $0x18] sm:$0xff] (!%p244_p2)  ;;  %v394_v14 = vld [vmem:[%s1138_s3 + $0xa0] sm:$0xff] (!%p244_p2)  ;;  %v395_v15 = vld [vmem:[%s1138_s3 + $0xa8] sm:$0xff] (!%p244_p2)  ;;  %v322_v3 = vshrl.u32 (!%p244_p2), %v321_v53, 7 }
   0x9   : > { %822 = vmatpush3.bf16.msra.mxu0 (!%p244_p2), %v821_v7  ;;  %v825_v16 = vpack.c.bf16 (!%p244_p2), %v377_v13, %v376_v11  ;;  %v408_v17 = vld [vmem:[%s1138_s3 + $0x110] sm:$0xff] (!%p244_p2)  ;;  %v409_v18 = vld [vmem:[%s1138_s3 + $0x118] sm:$0xff] (!%p244_p2)  ;;  %v827_v19 = vpack.c.bf16 (!%p244_p2), %v395_v15, %v394_v14  ;;  %v378_v21 = vld [vmem:[%s1138_s3 + $0x20] sm:$0xff] (!%p244_p2) }
   0xa   : > { %824 = vmatprep.subr.bf16.mxu0 (!%p244_p2), %v823_v8  ;;  %852 = vmatprep.subr.bf16.mxu1 (!%p244_p2), %v851_v12  ;;  %v855_v20 = vpack.c.bf16 (!%p244_p2), %v409_v18, %v408_v17  ;;  %v379_v22 = vld [vmem:[%s1138_s3 + $0x28] sm:$0xff] (!%p244_p2)  ;;  %v396_v23 = vld [vmem:[%s1138_s3 + $0xb0] sm:$0xff] (!%p244_p2)  ;;  %v397_v24 = vld [vmem:[%s1138_s3 + $0xb8] sm:$0xff] (!%p244_p2)  ;;  %vm365_vm0 = vcmp.lt.s32.totalorder (!%p244_p2), %v322_v3, 7  ;;  %vm352_vm1 = vcmp.lt.s32.totalorder (!%p244_p2), %v322_v3, 1 }
   0xb   : > { %854 = vmatpush3.bf16.msra.mxu1 (!%p244_p2), %v851_v12  ;;  %v410_v25 = vld [vmem:[%s1138_s3 + $0x120] sm:$0xff] (!%p244_p2)  ;;  %v411_v26 = vld [vmem:[%s1138_s3 + $0x128] sm:$0xff] (!%p244_p2)  ;;  %v829_v28 = vpack.c.bf16 (!%p244_p2), %v379_v22, %v378_v21  ;;  %v412_v29 = vld [vmem:[%s1138_s3 + $0x130] sm:$0xff] (!%p244_p2)  ;;  %v831_v31 = vpack.c.bf16 (!%p244_p2), %v397_v24, %v396_v23  ;;  %v323_v21 = vadd.s32 (!%p244_p2), 8, %v322_v3  ;;  %v328_v24 = vand.u32 (!%p244_p2), 15, %v322_v3 }
   0xc   : > { %856 = vmatprep.subr.bf16.mxu1 (!%p244_p2), %v855_v20  ;;  %v859_v27 = vpack.c.bf16 (!%p244_p2), %v411_v26, %v410_v25  ;;  %v413_v30 = vld [vmem:[%s1138_s3 + $0x138] sm:$0xff] (!%p244_p2)  ;;  %v380_v32 = vld [vmem:[%s1138_s3 + $0x30] sm:$0xff] (!%p244_p2)  ;;  %v398_v34 = vld [vmem:[%s1138_s3 + $0xc0] sm:$0xff] (!%p244_p2) }
   0xd   : > { %s1145_s9 = smov (!%p968_p3, %s713_s9), 3  ;;  %826 = vmatpush3.bf16.msra.mxu0 %v825_v16  ;;  %v381_v33 = vld [vmem:[%s1138_s3 + $0x38] sm:$0xff]  ;;  %v399_v35 = vld [vmem:[%s1138_s3 + $0xc8] sm:$0xff]  ;;  %v863_v36 = vpack.c.bf16 %v413_v30, %v412_v29  ;;  %v414_v38 = vld [vmem:[%s1138_s3 + $0x140] sm:$0xff]  ;;  %vm726_vm2 = vcmp.ne.s32.totalorder %v328_v24, 0  ;;  %s1147_s25 = smov (!%p293_p4, %s945_s25), 1 }
   0xe   : > { %828 = vmatprep.subr.bf16.mxu0 %v827_v19  ;;  %s714_s13 = sshll.u32 %s1145_s9, 3  ;;  %v833_v37 = vpack.c.bf16 %v381_v33, %v380_v32  ;;  %v415_v39 = vld [vmem:[%s1138_s3 + $0x148] sm:$0xff]  ;;  %v835_v40 = vpack.c.bf16 %v399_v35, %v398_v34  ;;  %v382_v41 = vld [vmem:[%s1138_s3 + $0x40] sm:$0xff]  ;;  %v400_v43 = vld [vmem:[%s1138_s3 + $0xd0] sm:$0xff]  ;;  %s295_s19 = scalar_lea.vmem %s1141_s6, %s1147_s25 }
   0xf   : > { %858 = vmatpush3.bf16.msra.mxu1 %v855_v20  ;;  %s285_s27 = scalar_lea.vmem %s1135_s0, %s714_s13  ;;  %v383_v42 = vld [vmem:[%s1138_s3 + $0x48] sm:$0xff]  ;;  %v401_v44 = vld [vmem:[%s1138_s3 + $0xd8] sm:$0xff]  ;;  %v867_v45 = vpack.c.bf16 %v415_v39, %v414_v38  ;;  %v416_v46 = vld [vmem:[%s1138_s3 + $0x150] sm:$0xff]  ;;  %s291_s17 = scalar_lea.vmem %s1140_s5, %s714_s13 }
  0x10   : > { %860 = vmatprep.subr.bf16.mxu1 %v859_v27  ;;  %v299_v47 = vld [vmem:[%s285_s27] sm:$0xff]  ;;  %v300_v48 = vld [vmem:[%s285_s27 + $0x8] sm:$0xff]  ;;  %v837_v49 = vpack.c.bf16 %v383_v42, %v382_v41  ;;  %v417_v50 = vld [vmem:[%s1138_s3 + $0x158] sm:$0xff]  ;;  %v839_v54 = vpack.c.bf16 %v401_v44, %v400_v43  ;;  %s298_s21 = scalar_lea.vmem %s1142_s7, %s1147_s25 }
  0x11   : > { %830 = vmatpush3.bf16.msra.mxu0 %v829_v28  ;;  %v717_v51 = vld [vmem:[%s1136_s1] ss:$0 sm:$0xff]  ;;  %v384_v55 = vld [vmem:[%s1138_s3 + $0x50] sm:$0xff]  ;;  %v385_v56 = vld [vmem:[%s1138_s3 + $0x58] sm:$0xff]  ;;  %v871_v61 = vpack.c.bf16 %v417_v50, %v416_v46 }
  0x12   : > { %832 = vmatprep.subr.bf16.mxu0 %v831_v31  ;;  %v718_v52 = vld [vmem:[%s1137_s2] ss:$0 sm:$0xff]  ;;  %v308_v57 = vmul.f32 %v717_v51, %v299_v47  ;;  %v309_v58 = vmul.f32 %v717_v51, %v300_v48  ;;  %v403_v60 = vld [vmem:[%s1138_s3 + $0xe8] sm:$0xff]  ;;  %v841_v0 = vpack.c.bf16 %v385_v56, %v384_v55  ;;  %v404_v9 = vld [vmem:[%s1138_s3 + $0xf0] sm:$0xff] }
  0x13   : > { %862 = vmatpush3.bf16.msra.mxu1 %v859_v27  ;;  %v402_v59 = vld [vmem:[%s1138_s3 + $0xe0] sm:$0xff]  ;;  %v419_v2 = vld [vmem:[%s1138_s3 + $0x168] sm:$0xff]  ;;  %v405_v10 = vld [vmem:[%s1138_s3 + $0xf8] sm:$0xff]  ;;  %v335_v27 = vand.u32 15, %v323_v21 }
  0x14   : > { %864 = vmatprep.subr.bf16.mxu1 %v863_v36  ;;  %v317_v62 = vadd.f32 %v718_v52, %v308_v57  ;;  %v318_v63 = vadd.f32 %v718_v52, %v309_v58  ;;  %v418_v1 = vld [vmem:[%s1138_s3 + $0x160] sm:$0xff]  ;;  %v843_v4 = vpack.c.bf16 %v403_v60, %v402_v59  ;;  %v387_v6 = vld [vmem:[%s1138_s3 + $0x68] sm:$0xff]  ;;  %v420_v15 = vld [vmem:[%s1138_s3 + $0x170] sm:$0xff]  ;;  %v847_v17 = vpack.c.bf16 %v405_v10, %v404_v9 }
  0x15   : > { %834 = vmatpush3.bf16.msra.mxu0 %v833_v37  ;;  %v386_v5 = vld [vmem:[%s1138_s3 + $0x60] sm:$0xff]  ;;  %v875_v11 = vpack.c.bf16 %v419_v2, %v418_v1  ;;  %v421_v16 = vld [vmem:[%s1138_s3 + $0x178] sm:$0xff]  ;;  %v388_v18 = vld [vmem:[%s1138_s3 + $0x70] sm:$0xff]  ;;  %vm727_vm3 = vcmp.ne.s32.totalorder %v335_v27, 15 }
  0x16   : > { %836 = vmatprep.subr.bf16.mxu0 %v835_v40  ;;  %v319_v7 = vmax.f32 %v317_v62, 0.0  ;;  %v320_v8 = vmax.f32 %v318_v63, 0.0  ;;  %v845_v14 = vpack.c.bf16 %v387_v6, %v386_v5  ;;  %v389_v19 = vld [vmem:[%s1138_s3 + $0x78] sm:$0xff]  ;;  %v879_v22 = vpack.c.bf16 %v421_v16, %v420_v15  ;;  %v719_v33 = vld [vmem:[%s1139_s4] ss:$0 sm:$0xff] }
  0x17   : > { %866 = vmatpush3.bf16.msra.mxu1 %v863_v36  ;;  %v849_v23 = vpack.c.bf16 %v389_v19, %v388_v18 }
  0x18   : > { %868 = vmatprep.subr.bf16.mxu1 %v867_v45  ;;  %493 = vmatprep.mubr.f32.mxu0 %v319_v7  ;;  %v363_v12 = vrot.slane %v319_v7, 1  ;;  %v364_v13 = vrot.slane %v320_v8, 1  ;;  %v350_v25 = vrot.slane %v319_v7, 7  ;;  %v351_v26 = vrot.slane %v320_v8, 7 }
  0x19   : > { %838 = vmatpush3.bf16.msra.mxu0 %v837_v49 }
  0x1a   : > { %840 = vmatprep.subr.bf16.mxu0 %v839_v54  ;;  %v366_v20 = vsel %vm365_vm0, %v363_v12, %v364_v13  ;;  %v354_v28 = vsel %vm352_vm1, %v351_v26, %v350_v25  ;;  %v367_v29 = vsel %vm365_vm0, %v364_v13, %v363_v12  ;;  %v353_v30 = vsel %vm352_vm1, %v350_v25, %v351_v26 }
  0x1b   : > { %870 = vmatpush3.bf16.msra.mxu1 %v867_v45  ;;  %816 = vmatprep.mubr.f32.mxu1 %v366_v20 }
  0x1c   : > { %872 = vmatprep.subr.bf16.mxu1 %v871_v61 }
  0x1d   : > { %842 = vmatpush3.bf16.msra.mxu0 %v841_v0 }
  0x1e   : > { %844 = vmatprep.subr.bf16.mxu0 %v843_v4 }
  0x1f   : > { %874 = vmatpush3.bf16.msra.mxu1 %v871_v61 }
  0x20   : > { %876 = vmatprep.subr.bf16.mxu1 %v875_v11 }
  0x21   : > { %846 = vmatpush3.bf16.msra.mxu0 %v845_v14 }
  0x22   : > { %848 = vmatprep.subr.bf16.mxu0 %v847_v17 }
  0x23   : > { %878 = vmatpush3.bf16.msra.mxu1 %v875_v11 }
  0x24   : > { %880 = vmatprep.subr.bf16.mxu1 %v879_v22 }
  0x25   : > { %850 = vmatpush3.bf16.msra.mxu0 %v849_v23 }
  0x27   : > { %882 = vmatpush3.bf16.msra.mxu1 %v879_v22 }
  0x28   : > { %721 = vmatmul.mubr.msk.f32.vlgmr.msra.gmra.mrb[0].mxu0 %vm726_vm2, %v354_v28 }
  0x29   : > { %498 = vmatprep.mubr.f32.mxu0 %v320_v8 }
  0x2a   : > { %817 = vmatmul.mubr.msk.f32.vlgmr.msra.gmra.mrb[0].mxu1 %vm727_vm3, %v367_v29 }
  0x2c   : > { %499 = vmatmul.mubr.f32.gmra.mrb[2].mxu0 %v353_v30 }
  0xfb   : > { %v760_v31 = vpop.f32.mrb[0].mxu0 }
  0xfc   : > { %v761_v32 = vpop.f32.mrb[1].mxu0 }
  0xfd   : > { %v762_v34 = vadd.f32 %v761_v32, %v760_v31  ;;  %v818_v35 = vpop.f32.mrb[0].mxu1 }
  0xfe   : > { %v570_v36 = vpop.f32.mrb[1].mxu1 }
  0xff   : > { %v763_v37 = vpop.f32.mrb[2].mxu0  ;;  %v496_v38 = vadd.f32 %v762_v34, %v719_v33 }
 0x100   : > { %v764_v39 = vpop.f32.mrb[3].mxu0 }
 0x101   : > { %v765_v40 = vadd.f32 %v764_v39, %v763_v37  ;;  %v571_v41 = vadd.f32 %v570_v36, %v496_v38 }
 0x103   : > { %v501_v42 = vadd.f32 %v765_v40, %v719_v33  ;;  %579 = vst [vmem:[%s291_s17] sm:$0xff] %v571_v41 }
 0x105   : > { %v576_v43 = vadd.f32 %v818_v35, %v501_v42 }
 0x107   : > { %580 = vst [vmem:[%s291_s17 + $0x8] sm:$0xff] %v576_v43  ;;  %v581_v44 = vadd.f32 %v576_v43, %v571_v41 }
 0x109   : > { %v582_v45 = vrot.slane %v581_v44, 4 }
 0x10b   : > { %v583_v46 = vadd.f32 %v582_v45, %v581_v44 }
 0x10d   : > { %v584_v47 = vrot.slane %v583_v46, 2 }
 0x10f   : > { %v585_v48 = vadd.f32 %v584_v47, %v583_v46 }
 0x111   : > { %v586_v49 = vrot.slane %v585_v48, 1 }
 0x113   : > { %v587_v50 = vadd.f32 %v586_v49, %v585_v48 }
 0x115   : > { %v588_v51 = vmul.f32 0.0625, %v587_v50  ;;  %600 = vst [vmem:[%s295_s19] sm:$0x1] %v587_v50 }
 0x117   : > { %v589_v52 = vsub.f32 %v571_v41, %v588_v51  ;;  %v590_v53 = vsub.f32 %v576_v43, %v588_v51 }
 0x119   : > { %v591_v54 = vmul.f32 %v589_v52, %v589_v52  ;;  %v592_v55 = vmul.f32 %v590_v53, %v590_v53 }
 0x11b   : > { %v593_v56 = vadd.f32 %v592_v55, %v591_v54 }
 0x11d   : > { %v594_v57 = vrot.slane %v593_v56, 4 }
 0x11f   : > { %v595_v58 = vadd.f32 %v594_v57, %v593_v56 }
 0x121   : > { %v596_v59 = vrot.slane %v595_v58, 2 }
 0x123   : > { %v597_v60 = vadd.f32 %v596_v59, %v595_v58 }
 0x125   : > { %v598_v61 = vrot.slane %v597_v60, 1 }
 0x127   : > { %v599_v62 = vadd.f32 %v598_v61, %v597_v60 }
 0x129   : > { %601 = vst [vmem:[%s298_s21] sm:$0x1] %v599_v62 }
 0x12a PF: > { %s18_s24 = sadd.s32 1, %s897_s24  }
 0x12b   : > { %p15_p5 = scmp.ge.s32.totalorder %s18_s24, 4  }
 0x12d   :  { %17 = sbr.rel (!%p15_p5) target bundleno = 1 (0x1), region = 94 }

// kernel: residual_block.7
= control target key start
LH: loop header
LB: loop body
LE: loop exit
PB: predicated region body
PF: predicated region fallthrough
CT: control target
= control target key end

     0   :  { %s1094_s30 = smov 0   ;;  %s1295_s0 = inlined_call_operand.vmem [shape: f32[32,128], index: 0, kind: input, shape index: {}]   ;;  %s1296_s1 = inlined_call_operand.vmem [shape: f32[1,128], index: 1, kind: input, shape index: {}]   ;;  %s1297_s2 = inlined_call_operand.vmem [shape: f32[1,128], index: 2, kind: input, shape index: {}]   ;;  %s1298_s3 = inlined_call_operand.vmem [shape: f32[32,128], index: 3, kind: input, shape index: {}]   ;;  %s1299_s4 = inlined_call_operand.vmem [shape: f32[384,128], index: 4, kind: input, shape index: {}]   ;;  %s1300_s5 = inlined_call_operand.vmem [shape: f32[1,128], index: 5, kind: input, shape index: {}]   ;;  %s1301_s6 = inlined_call_operand.vmem [shape: f32[32,128], index: 6, kind: output, shape index: {0}]   ;;  %s1302_s7 = inlined_call_operand.vmem [shape: f32[2,1,128], index: 7, kind: output, shape index: {1}]   ;;  %s1303_s8 = inlined_call_operand.vmem [shape: f32[2,1,128], index: 8, kind: output, shape index: {2}]   ;;  %s1304_s9 = inlined_call_operand.vmem [shape: f32[32,128], index: 9, kind: output, shape index: {3}]  }
   0x1 LB: > { %s1100_s10 = sadd.s32 4294967295, %s1042_s30   ;;  %p853_p0 = scmp.ge.s32.totalorder %s1042_s30, 1  ;;  %s1042_s30 = sphi %s1094_s30, %s20_s30  }
   0x2   : > { %p306_p1 = scmp.lt.s32.totalorder %s1042_s30, 3 }
   0x4   : > { %p307_p2 = pnand %p853_p0, %p306_p1 }
   0x5   : > { %v485_v0 = vld [vmem:[%s1299_s4 + $0x80] sm:$0xff] (!%p307_p2)  ;;  %v486_v1 = vld [vmem:[%s1299_s4 + $0x88] sm:$0xff] (!%p307_p2)  ;;  %s854_s17 = sshll.u32 (!%p307_p2), %s1100_s10, 1  ;;  %v487_v5 = vld [vmem:[%s1299_s4 + $0x90] sm:$0xff] (!%p307_p2)  ;;  %v416_v62 = vlaneseq (!%p307_p2)  ;;  %p376_p4 = scmp.lt.s32.totalorder (!%p307_p2), %s1100_s10, 1 }
   0x6   : > { %310 = sbr.rel (%p307_p2) target bundleno = 298 (0x12a), region = 44  ;;  %v469_v2 = vld [vmem:[%s1299_s4] sm:$0xff] (!%p307_p2)  ;;  %v964_v3 = vpack.c.bf16 (!%p307_p2), %v486_v1, %v485_v0  ;;  %v470_v4 = vld [vmem:[%s1299_s4 + $0x8] sm:$0xff] (!%p307_p2)  ;;  %v488_v6 = vld [vmem:[%s1299_s4 + $0x98] sm:$0xff] (!%p307_p2)  ;;  %p1123_p3 = scmp.lt.s32.totalorder (!%p307_p2), %s854_s17, 3 }
   0x7   : > { %v966_v7 = vpack.c.bf16 (!%p307_p2), %v470_v4, %v469_v2  ;;  %v968_v8 = vpack.c.bf16 (!%p307_p2), %v488_v6, %v487_v5  ;;  %v501_v9 = vld [vmem:[%s1299_s4 + $0x100] sm:$0xff] (!%p307_p2)  ;;  %v502_v10 = vld [vmem:[%s1299_s4 + $0x108] sm:$0xff] (!%p307_p2)  ;;  %v471_v11 = vld [vmem:[%s1299_s4 + $0x10] sm:$0xff] (!%p307_p2) }
   0x8   : > { %965 = vmatprep.subr.bf16.mxu0 (!%p307_p2), %v964_v3  ;;  %v996_v12 = vpack.c.bf16 (!%p307_p2), %v502_v10, %v501_v9  ;;  %v472_v13 = vld [vmem:[%s1299_s4 + $0x18] sm:$0xff] (!%p307_p2)  ;;  %v489_v14 = vld [vmem:[%s1299_s4 + $0xa0] sm:$0xff] (!%p307_p2)  ;;  %v490_v15 = vld [vmem:[%s1299_s4 + $0xa8] sm:$0xff] (!%p307_p2) }
   0x9   : > { %967 = vmatpush3.bf16.msra.mxu0 (!%p307_p2), %v966_v7  ;;  %v970_v16 = vpack.c.bf16 (!%p307_p2), %v472_v13, %v471_v11  ;;  %v503_v17 = vld [vmem:[%s1299_s4 + $0x110] sm:$0xff] (!%p307_p2)  ;;  %v504_v18 = vld [vmem:[%s1299_s4 + $0x118] sm:$0xff] (!%p307_p2)  ;;  %v972_v19 = vpack.c.bf16 (!%p307_p2), %v490_v15, %v489_v14  ;;  %v473_v21 = vld [vmem:[%s1299_s4 + $0x20] sm:$0xff] (!%p307_p2) }
   0xa   : > { %969 = vmatprep.subr.bf16.mxu0 (!%p307_p2), %v968_v8  ;;  %997 = vmatprep.subr.bf16.mxu1 (!%p307_p2), %v996_v12  ;;  %v1000_v20 = vpack.c.bf16 (!%p307_p2), %v504_v18, %v503_v17  ;;  %v474_v22 = vld [vmem:[%s1299_s4 + $0x28] sm:$0xff] (!%p307_p2)  ;;  %v491_v23 = vld [vmem:[%s1299_s4 + $0xb0] sm:$0xff] (!%p307_p2)  ;;  %v492_v24 = vld [vmem:[%s1299_s4 + $0xb8] sm:$0xff] (!%p307_p2) }
   0xb   : > { %999 = vmatpush3.bf16.msra.mxu1 (!%p307_p2), %v996_v12  ;;  %v505_v25 = vld [vmem:[%s1299_s4 + $0x120] sm:$0xff] (!%p307_p2)  ;;  %v506_v26 = vld [vmem:[%s1299_s4 + $0x128] sm:$0xff] (!%p307_p2)  ;;  %v974_v28 = vpack.c.bf16 (!%p307_p2), %v474_v22, %v473_v21  ;;  %v507_v29 = vld [vmem:[%s1299_s4 + $0x130] sm:$0xff] (!%p307_p2)  ;;  %v976_v31 = vpack.c.bf16 (!%p307_p2), %v492_v24, %v491_v23  ;;  %v417_v12 = vshrl.u32 (!%p307_p2), %v416_v62, 7 }
   0xc   : > { %1001 = vmatprep.subr.bf16.mxu1 (!%p307_p2), %v1000_v20  ;;  %v1004_v27 = vpack.c.bf16 (!%p307_p2), %v506_v26, %v505_v25  ;;  %v508_v30 = vld [vmem:[%s1299_s4 + $0x138] sm:$0xff] (!%p307_p2)  ;;  %v475_v32 = vld [vmem:[%s1299_s4 + $0x30] sm:$0xff] (!%p307_p2)  ;;  %v493_v34 = vld [vmem:[%s1299_s4 + $0xc0] sm:$0xff] (!%p307_p2) }
   0xd   : > { %s1307_s17 = smov (!%p1123_p3, %s854_s17), 3  ;;  %971 = vmatpush3.bf16.msra.mxu0 %v970_v16  ;;  %v476_v33 = vld [vmem:[%s1299_s4 + $0x38] sm:$0xff]  ;;  %v494_v35 = vld [vmem:[%s1299_s4 + $0xc8] sm:$0xff]  ;;  %v1008_v36 = vpack.c.bf16 %v508_v30, %v507_v29  ;;  %v509_v38 = vld [vmem:[%s1299_s4 + $0x140] sm:$0xff]  ;;  %vm460_vm0 = vcmp.lt.s32.totalorder %v417_v12, 7  ;;  %v418_v24 = vadd.s32 8, %v417_v12 }
   0xe   : > { %973 = vmatprep.subr.bf16.mxu0 %v972_v19  ;;  %s1183_s26 = sshll.u32 %s1307_s17, 3  ;;  %v978_v37 = vpack.c.bf16 %v476_v33, %v475_v32  ;;  %v510_v39 = vld [vmem:[%s1299_s4 + $0x148] sm:$0xff]  ;;  %v980_v40 = vpack.c.bf16 %v494_v35, %v493_v34  ;;  %v477_v41 = vld [vmem:[%s1299_s4 + $0x40] sm:$0xff]  ;;  %v495_v43 = vld [vmem:[%s1299_s4 + $0xd0] sm:$0xff]  ;;  %vm447_vm1 = vcmp.lt.s32.totalorder %v417_v12, 1  ;;  %s1309_s10 = smov (!%p376_p4, %s1100_s10), 1 }
   0xf   : > { %1003 = vmatpush3.bf16.msra.mxu1 %v1000_v20  ;;  %s362_s18 = scalar_lea.vmem %s1295_s0, %s1183_s26  ;;  %v478_v42 = vld [vmem:[%s1299_s4 + $0x48] sm:$0xff]  ;;  %v496_v44 = vld [vmem:[%s1299_s4 + $0xd8] sm:$0xff]  ;;  %v1012_v45 = vpack.c.bf16 %v510_v39, %v509_v38  ;;  %v511_v46 = vld [vmem:[%s1299_s4 + $0x150] sm:$0xff]  ;;  %s368_s13 = scalar_lea.vmem %s1298_s3, %s1183_s26 }
  0x10   : > { %1005 = vmatprep.subr.bf16.mxu1 %v1004_v27  ;;  %v388_v47 = vld [vmem:[%s362_s18] sm:$0xff]  ;;  %v389_v48 = vld [vmem:[%s362_s18 + $0x8] sm:$0xff]  ;;  %v982_v49 = vpack.c.bf16 %v478_v42, %v477_v41  ;;  %v512_v50 = vld [vmem:[%s1299_s4 + $0x158] sm:$0xff]  ;;  %v984_v53 = vpack.c.bf16 %v496_v44, %v495_v43  ;;  %s386_s23 = scalar_lea.vmem %s1304_s9, %s1183_s26  ;;  %s374_s19 = scalar_lea.vmem %s1301_s6, %s1183_s26 }
  0x11   : > { %975 = vmatpush3.bf16.msra.mxu0 %v974_v28  ;;  %v862_v51 = vld [vmem:[%s1296_s1] ss:$0 sm:$0xff]  ;;  %v479_v54 = vld [vmem:[%s1299_s4 + $0x50] sm:$0xff]  ;;  %v480_v55 = vld [vmem:[%s1299_s4 + $0x58] sm:$0xff]  ;;  %v1016_v63 = vpack.c.bf16 %v512_v50, %v511_v46  ;;  %v423_v28 = vand.u32 15, %v417_v12  ;;  %s378_s18 = scalar_lea.vmem %s1302_s7, %s1309_s10 }
  0x12   : > { %977 = vmatprep.subr.bf16.mxu0 %v976_v31  ;;  %v863_v52 = vld [vmem:[%s1297_s2] ss:$0 sm:$0xff]  ;;  %v397_v57 = vmul.f32 %v862_v51, %v388_v47  ;;  %v398_v58 = vmul.f32 %v862_v51, %v389_v48  ;;  %v498_v59 = vld [vmem:[%s1299_s4 + $0xe8] sm:$0xff]  ;;  %v986_v2 = vpack.c.bf16 %v480_v55, %v479_v54  ;;  %v499_v10 = vld [vmem:[%s1299_s4 + $0xf0] sm:$0xff]  ;;  %v430_v31 = vand.u32 15, %v418_v24 }
  0x13   : > { %1007 = vmatpush3.bf16.msra.mxu1 %v1004_v27  ;;  %v497_v56 = vld [vmem:[%s1299_s4 + $0xe0] sm:$0xff]  ;;  %v409_v61 = vld [vmem:[%s368_s13 + $0x8] sm:$0xff]  ;;  %v500_v11 = vld [vmem:[%s1299_s4 + $0xf8] sm:$0xff]  ;;  %vm871_vm2 = vcmp.ne.s32.totalorder %v423_v28, 0 }
  0x14   : > { %1009 = vmatprep.subr.bf16.mxu1 %v1008_v36  ;;  %v408_v60 = vld [vmem:[%s368_s13] sm:$0xff]  ;;  %v406_v0 = vadd.f32 %v863_v52, %v397_v57  ;;  %v407_v1 = vadd.f32 %v863_v52, %v398_v58  ;;  %v514_v4 = vld [vmem:[%s1299_s4 + $0x168] sm:$0xff]  ;;  %v988_v5 = vpack.c.bf16 %v498_v59, %v497_v56  ;;  %v515_v17 = vld [vmem:[%s1299_s4 + $0x170] sm:$0xff]  ;;  %v992_v19 = vpack.c.bf16 %v500_v11, %v499_v10 }
  0x15   : > { %979 = vmatpush3.bf16.msra.mxu0 %v978_v37  ;;  %v513_v3 = vld [vmem:[%s1299_s4 + $0x160] sm:$0xff]  ;;  %v482_v7 = vld [vmem:[%s1299_s4 + $0x68] sm:$0xff]  ;;  %v516_v18 = vld [vmem:[%s1299_s4 + $0x178] sm:$0xff]  ;;  %vm872_vm3 = vcmp.ne.s32.totalorder %v430_v31, 15 }
  0x16   : > { %981 = vmatprep.subr.bf16.mxu0 %v980_v40  ;;  %v481_v6 = vld [vmem:[%s1299_s4 + $0x60] sm:$0xff]  ;;  %v410_v8 = vadd.f32 %v408_v60, %v406_v0  ;;  %v411_v9 = vadd.f32 %v409_v61, %v407_v1  ;;  %v1020_v13 = vpack.c.bf16 %v514_v4, %v513_v3  ;;  %v483_v20 = vld [vmem:[%s1299_s4 + $0x70] sm:$0xff]  ;;  %v484_v21 = vld [vmem:[%s1299_s4 + $0x78] sm:$0xff]  ;;  %v1024_v25 = vpack.c.bf16 %v516_v18, %v515_v17 }
  0x17   : > { %1011 = vmatpush3.bf16.msra.mxu1 %v1008_v36  ;;  %v990_v16 = vpack.c.bf16 %v482_v7, %v481_v6  ;;  %v994_v27 = vpack.c.bf16 %v484_v21, %v483_v20  ;;  %v864_v37 = vld [vmem:[%s1300_s5] ss:$0 sm:$0xff] }
  0x18   : > { %1013 = vmatprep.subr.bf16.mxu1 %v1012_v45  ;;  %v412_v14 = vmax.f32 %v410_v8, 0.0  ;;  %v413_v15 = vmax.f32 %v411_v9, 0.0 }
  0x19   : > { %983 = vmatpush3.bf16.msra.mxu0 %v982_v49 }
  0x1a   : > { %985 = vmatprep.subr.bf16.mxu0 %v984_v53  ;;  %414 = vst [vmem:[%s386_s23] sm:$0xff] %v412_v14  ;;  %588 = vmatprep.mubr.f32.mxu0 %v412_v14  ;;  %v458_v22 = vrot.slane %v412_v14, 1  ;;  %v459_v23 = vrot.slane %v413_v15, 1  ;;  %415 = vst [vmem:[%s386_s23 + $0x8] sm:$0xff] %v413_v15  ;;  %v445_v29 = vrot.slane %v412_v14, 7  ;;  %v446_v30 = vrot.slane %v413_v15, 7  ;;  %s381_s23 = scalar_lea.vmem %s1303_s8, %s1309_s10 }
  0x1b   : > { %1015 = vmatpush3.bf16.msra.mxu1 %v1012_v45 }
  0x1c   : > { %1017 = vmatprep.subr.bf16.mxu1 %v1016_v63  ;;  %v461_v26 = vsel %vm460_vm0, %v458_v22, %v459_v23  ;;  %v449_v32 = vsel %vm447_vm1, %v446_v30, %v445_v29  ;;  %v462_v33 = vsel %vm460_vm0, %v459_v23, %v458_v22  ;;  %v448_v34 = vsel %vm447_vm1, %v445_v29, %v446_v30 }
  0x1d   : > { %987 = vmatpush3.bf16.msra.mxu0 %v986_v2  ;;  %961 = vmatprep.mubr.f32.mxu1 %v461_v26 }
  0x1e   : > { %989 = vmatprep.subr.bf16.mxu0 %v988_v5 }
  0x1f   : > { %1019 = vmatpush3.bf16.msra.mxu1 %v1016_v63 }
  0x20   : > { %1021 = vmatprep.subr.bf16.mxu1 %v1020_v13 }
  0x21   : > { %991 = vmatpush3.bf16.msra.mxu0 %v990_v16 }
  0x22   : > { %993 = vmatprep.subr.bf16.mxu0 %v992_v19 }
  0x23   : > { %1023 = vmatpush3.bf16.msra.mxu1 %v1020_v13 }
  0x24   : > { %1025 = vmatprep.subr.bf16.mxu1 %v1024_v25 }
  0x25   : > { %995 = vmatpush3.bf16.msra.mxu0 %v994_v27 }
  0x27   : > { %1027 = vmatpush3.bf16.msra.mxu1 %v1024_v25 }
  0x28   : > { %866 = vmatmul.mubr.msk.f32.vlgmr.msra.gmra.mrb[0].mxu0 %vm871_vm2, %v449_v32 }
  0x29   : > { %593 = vmatprep.mubr.f32.mxu0 %v413_v15 }
  0x2a   : > { %962 = vmatmul.mubr.msk.f32.vlgmr.msra.gmra.mrb[0].mxu1 %vm872_vm3, %v462_v33 }
  0x2c   : > { %594 = vmatmul.mubr.f32.gmra.mrb[2].mxu0 %v448_v34 }
  0xfb   : > { %v905_v35 = vpop.f32.mrb[0].mxu0 }
  0xfc   : > { %v906_v36 = vpop.f32.mrb[1].mxu0 }
  0xfd   : > { %v907_v38 = vadd.f32 %v906_v36, %v905_v35  ;;  %v963_v39 = vpop.f32.mrb[0].mxu1 }
  0xfe   : > { %v665_v40 = vpop.f32.mrb[1].mxu1 }
  0xff   : > { %v908_v41 = vpop.f32.mrb[2].mxu0  ;;  %v591_v42 = vadd.f32 %v907_v38, %v864_v37 }
 0x100   : > { %v909_v43 = vpop.f32.mrb[3].mxu0 }
 0x101   : > { %v910_v44 = vadd.f32 %v909_v43, %v908_v41  ;;  %v666_v45 = vadd.f32 %v665_v40, %v591_v42 }
 0x103   : > { %v596_v46 = vadd.f32 %v910_v44, %v864_v37  ;;  %674 = vst [vmem:[%s374_s19] sm:$0xff] %v666_v45 }
 0x105   : > { %v671_v47 = vadd.f32 %v963_v39, %v596_v46 }
 0x107   : > { %675 = vst [vmem:[%s374_s19 + $0x8] sm:$0xff] %v671_v47  ;;  %v676_v48 = vadd.f32 %v671_v47, %v666_v45 }
 0x109   : > { %v677_v49 = vrot.slane %v676_v48, 4 }
 0x10b   : > { %v678_v50 = vadd.f32 %v677_v49, %v676_v48 }
 0x10d   : > { %v679_v51 = vrot.slane %v678_v50, 2 }
 0x10f   : > { %v680_v52 = vadd.f32 %v679_v51, %v678_v50 }
 0x111   : > { %v681_v53 = vrot.slane %v680_v52, 1 }
 0x113   : > { %v682_v54 = vadd.f32 %v681_v53, %v680_v52 }
 0x115   : > { %v683_v55 = vmul.f32 0.0625, %v682_v54  ;;  %695 = vst [vmem:[%s378_s18] sm:$0x1] %v682_v54 }
 0x117   : > { %v684_v56 = vsub.f32 %v666_v45, %v683_v55  ;;  %v685_v57 = vsub.f32 %v671_v47, %v683_v55 }
 0x119   : > { %v686_v58 = vmul.f32 %v684_v56, %v684_v56  ;;  %v687_v59 = vmul.f32 %v685_v57, %v685_v57 }
 0x11b   : > { %v688_v60 = vadd.f32 %v687_v59, %v686_v58 }
 0x11d   : > { %v689_v61 = vrot.slane %v688_v60, 4 }
 0x11f   : > { %v690_v62 = vadd.f32 %v689_v61, %v688_v60 }
 0x121   : > { %v691_v63 = vrot.slane %v690_v62, 2 }
 0x123   : > { %v692_v0 = vadd.f32 %v691_v63, %v690_v62 }
 0x125   : > { %v693_v1 = vrot.slane %v692_v0, 1 }
 0x127   : > { %v694_v2 = vadd.f32 %v693_v1, %v692_v0 }
 0x129   : > { %696 = vst [vmem:[%s381_s23] sm:$0x1] %v694_v2 }
 0x12a PF: > { %s20_s30 = sadd.s32 1, %s1042_s30  }
 0x12b   : > { %p17_p5 = scmp.ge.s32.totalorder %s20_s30, 4  }
 0x12d   :  { %19 = sbr.rel (!%p17_p5) target bundleno = 1 (0x1), region = 113 }

// kernel: residual_block.9
= control target key start
LH: loop header
LB: loop body
LE: loop exit
PB: predicated region body
PF: predicated region fallthrough
CT: control target
= control target key end

     0   :  { %s375_s15 = smov 0   ;;  %s401_s0 = inlined_call_operand.vmem [shape: f32[32,128], index: 0, kind: input, shape index: {}]   ;;  %s402_s1 = inlined_call_operand.vmem [shape: f32[1,128], index: 1, kind: input, shape index: {}]   ;;  %s403_s2 = inlined_call_operand.vmem [shape: f32[1,128], index: 2, kind: input, shape index: {}]   ;;  %s404_s3 = inlined_call_operand.vmem [shape: f32[32,128], index: 3, kind: input, shape index: {}]   ;;  %s405_s4 = inlined_call_operand.vmem [shape: f32[32,128], index: 4, kind: output, shape index: {}]  }
   0x1 LB: > { %s319_s16 = sadd.s32 4294967295, %s348_s15   ;;  %p323_p0 = scmp.ge.s32.totalorder %s348_s15, 1  ;;  %s348_s15 = sphi %s375_s15, %s14_s15  }
   0x2   : > { %p174_p1 = scmp.lt.s32.totalorder %s348_s15, 3 }
   0x4   : > { %p175_p2 = pnand %p323_p0, %p174_p1 }
   0x5   : > { %s324_s17 = sshll.u32 (!%p175_p2), %s319_s16, 1  ;;  %v330_v0 = vld [vmem:[%s402_s1] ss:$0 sm:$0xff] (!%p175_p2) }
   0x6   : > { %178 = sbr.rel (%p175_p2) target bundleno = 26 (0x1a), region = 36  ;;  %p206_p3 = scmp.lt.s32.totalorder (!%p175_p2), %s324_s17, 3  ;;  %v331_v3 = vld [vmem:[%s403_s2] ss:$0 sm:$0xff] (!%p175_p2) }
   0xd   : > { %s407_s17 = smov (!%p206_p3, %s324_s17), 3 }
   0xe   : > { %s325_s18 = sshll.u32 %s407_s17, 3 }
   0xf   : > { %s209_s23 = scalar_lea.vmem %s401_s0, %s325_s18  ;;  %s215_s26 = scalar_lea.vmem %s404_s3, %s325_s18 }
  0x10   : > { %v223_v1 = vld [vmem:[%s209_s23] sm:$0xff]  ;;  %v224_v2 = vld [vmem:[%s209_s23 + $0x8] sm:$0xff]  ;;  %s221_s5 = scalar_lea.vmem %s405_s4, %s325_s18 }
  0x11   : > { %v232_v4 = vmul.f32 %v330_v0, %v223_v1  ;;  %v233_v5 = vmul.f32 %v330_v0, %v224_v2  ;;  %v243_v6 = vld [vmem:[%s215_s26] sm:$0xff]  ;;  %v244_v7 = vld [vmem:[%s215_s26 + $0x8] sm:$0xff] }
  0x13   : > { %v241_v8 = vadd.f32 %v331_v3, %v232_v4  ;;  %v242_v9 = vadd.f32 %v331_v3, %v233_v5 }
  0x15   : > { %v245_v10 = vadd.f32 %v243_v6, %v241_v8  ;;  %v246_v11 = vadd.f32 %v244_v7, %v242_v9 }
  0x17   : > { %v247_v12 = vmax.f32 %v245_v10, 0.0  ;;  %v248_v13 = vmax.f32 %v246_v11, 0.0 }
  0x19   : > { %249 = vst [vmem:[%s221_s5] sm:$0xff] %v247_v12  ;;  %250 = vst [vmem:[%s221_s5 + $0x8] sm:$0xff] %v248_v13 }
  0x1a PF: > { %s14_s15 = sadd.s32 1, %s348_s15  }
  0x1b   : > { %p11_p4 = scmp.ge.s32.totalorder %s14_s15, 4  }
  0x1d   :  { %13 = sbr.rel (!%p11_p4) target bundleno = 1 (0x1), region = 69 }

</bundles_post_ra>
